<compile_context>
chip_gen: v7x
topology: tpu7x:2x2x1
jax: 0.10.0
libtpu: 0.0.40
codegen_flags: <defaults>
</compile_context>

<pallas_src>
import jax
import jax.numpy as jnp
from jax.experimental import pallas as pl
from jax.experimental.pallas import tpu as pltpu

# ---- model dimensions ----
N = 2                       # batch
CIN = 1                     # input channels
H = W = 16                  # input spatial
COUT = 8                    # conv output channels
KH = KW = 3                 # conv kernel
HP, WP = H // 2, W // 2     # pooled spatial (8, 8)
S = HP * WP                 # 64 pooled positions
HID = 16                    # skeleton.fc output features
FEAT = COUT * S             # 512 flattened features (NCHW flatten order)
EPS = 1e-5


def _vmem_full(shape):
    nd = len(shape)
    return pl.BlockSpec(shape, lambda i, nd=nd: (0,) * nd)


def _smem():
    return pl.BlockSpec(memory_space=pltpu.MemorySpace.SMEM)


# --------------------------- single fused kernel ---------------------------
def cnn_fused_kernel(taps_ref, cw_ref, cb_ref, w1_ref, b1_ref, g_ref, be_ref,
                     a_ref, w2_ref, b2_ref, o_ref):
    # taps_ref: (9, 4n, 64) VMEM -- tap k, row = (dy*2+dx)*n + i, lane = hp*8+wp
    # cw_ref:   (72,)  SMEM       -- conv weight, index k*8 + c
    # cb_ref:   (8,)   SMEM       -- conv bias
    # w1_ref:   (512, 16) VMEM    -- fc1 weight, row order = NCHW flatten (c*64 + s)
    # b1/g/be:  (1, 16) VMEM      -- fc1 bias, BN gamma, BN beta
    # a_ref:    (1,)   SMEM       -- PReLU alpha
    # w2_ref:   (1, 16) VMEM      -- fc2 weight row
    # b2_ref:   (1,)   SMEM       -- fc2 bias
    rows = taps_ref.shape[1]          # 4 * n
    n = rows // 4

    # --- 3x3 conv: k-outer / channel-inner; exactly one dense (4n,64) tap tile live at a time.
    acc = [None] * COUT
    for k in range(KH * KW):
        tap = taps_ref[k]                                   # (4n, 64) -- one vld, one tile
        for c in range(COUT):
            t = tap * cw_ref[k * COUT + c]                  # scalar-broadcast VPU MAC
            acc[c] = t if acc[c] is None else acc[c] + t

    # --- bias + ReLU + 2x2 max-pool (two sublane rolls on the XLU) per channel.
    pooled = []
    for c in range(COUT):
        r = jnp.maximum(acc[c] + cb_ref[c], 0.0)            # (4n, 64)
        z = jnp.maximum(r, pltpu.roll(r, shift=2 * n, axis=0))
        z = jnp.maximum(z, pltpu.roll(z, shift=n, axis=0))  # rows [0:n] = pooled_c
        pooled.append(z)

    # --- NCHW-flatten feature slab via lane-concat, then ONE K=512 MXU matmul for fc1.
    feats = jnp.concatenate(pooled, axis=1)                 # (4n, 512); rows [0:n] valid
    h = jnp.dot(feats, w1_ref[...],
                preferred_element_type=jnp.float32)[:n] + b1_ref[...]   # (n, 16)

    # --- BatchNorm1d, training mode: biased batch statistics.
    mean = jnp.mean(h, axis=0, keepdims=True)
    var = jnp.mean((h - mean) ** 2, axis=0, keepdims=True)
    hn = (h - mean) * jax.lax.rsqrt(var + EPS) * g_ref[...] + be_ref[...]

    # --- PReLU (single shared alpha).
    alpha = a_ref[0]
    hprelu = jnp.where(hn >= 0.0, hn, alpha * hn)

    # --- Linear(16, 1) + Sigmoid (f32 lane reduction).
    z = jnp.sum(hprelu * w2_ref[...], axis=1, keepdims=True) + b2_ref[0]
    o_ref[...] = 1.0 / (1.0 + jnp.exp(-z))


# --------------------------- wrapper ---------------------------
def _build_taps_dense(x_nchw):
    """(n,1,16,16) NCHW -> (9, 4n, 64) dense conv taps.

    Row index within each tap k = (dy*2+dx)*n + sample, lane index = hp*8+wp, so each tap is a
    single sublane-aligned tile and the 2x2 pool is a max over sublane-strided row groups.
    Built with pad + 9 static slices + one stack/reshape/transpose (one small XLA fusion).
    """
    n = x_nchw.shape[0]
    xp = jnp.pad(x_nchw[:, 0], ((0, 0), (1, 1), (1, 1)))            # (n, 18, 18), padding=1
    wins = jnp.stack([xp[:, kh:kh + H, kw:kw + W]
                      for kh in range(KH) for kw in range(KW)], axis=0)   # (9, n, 16, 16)
    wins = wins.reshape(KH * KW, n, HP, 2, WP, 2)                   # (k, i, hp, dy, wp, dx)
    taps = jnp.transpose(wins, (0, 3, 5, 1, 2, 4))                  # (k, dy, dx, i, hp, wp)
    return taps.reshape(KH * KW, 4 * n, S)                          # (9, 4n, 64)


def cnn_forward(x_nchw, params):
    n = x_nchw.shape[0]
    taps = _build_taps_dense(x_nchw.astype(jnp.float32))            # (9, 4n, 64)
    conv_w = params["conv_w"].reshape(-1)                           # (72,) 1-D SMEM (no 2-D pad)

    kernel = pl.pallas_call(
        cnn_fused_kernel,
        out_shape=jax.ShapeDtypeStruct((n, 1), jnp.float32),
        grid=(1,),
        in_specs=[
            _vmem_full((KH * KW, 4 * n, S)),   # taps
            _smem(),                           # conv_w  (72,)
            _smem(),                           # conv_b  (8,)
            _vmem_full((FEAT, HID)),           # fc1_w   (512, 16)
            _vmem_full((1, HID)),              # fc1_b
            _vmem_full((1, HID)),              # bn_gamma
            _vmem_full((1, HID)),              # bn_beta
            _smem(),                           # prelu_a (1,)
            _vmem_full((1, HID)),              # fc2_w   (1, 16)
            _smem(),                           # fc2_b   (1,)
        ],
        out_specs=_vmem_full((n, 1)),
        compiler_params=pltpu.CompilerParams(
            dimension_semantics=("arbitrary",)),
    )
    return kernel(taps, conv_w, params["conv_b"], params["fc1_w"],
                  params["fc1_b"].reshape(1, HID), params["bn_gamma"].reshape(1, HID),
                  params["bn_beta"].reshape(1, HID), params["prelu_a"].reshape(1),
                  params["fc2_w"].reshape(1, HID), params["fc2_b"].reshape(1))


# --------------------------- pure-JAX reference ---------------------------
def cnn_forward_ref(x_nchw, params):
    n = x_nchw.shape[0]
    xp = jnp.pad(x_nchw[:, 0], ((0, 0), (1, 1), (1, 1)))            # (n, 18, 18)
    w = params["conv_w"]                                            # (3, 3, COUT)
    conv = jnp.zeros((n, H, W, COUT), jnp.float32)
    for kh in range(KH):
        for kw in range(KW):
            conv = conv + xp[:, kh:kh + H, kw:kw + W, None] * w[kh, kw][None, None, None, :]
    conv = jnp.maximum(conv + params["conv_b"][None, None, None, :], 0.0)
    pooled = jnp.max(conv.reshape(n, HP, 2, WP, 2, COUT), axis=(2, 4))     # (n, 8, 8, 8)
    feats = jnp.transpose(pooled, (0, 3, 1, 2)).reshape(n, FEAT)           # NCHW flatten order
    h = feats @ params["fc1_w"] + params["fc1_b"][None, :]
    mean = jnp.mean(h, axis=0, keepdims=True)
    var = jnp.mean((h - mean) ** 2, axis=0, keepdims=True)
    hn = (h - mean) * jax.lax.rsqrt(var + EPS) * params["bn_gamma"][None, :] \
         + params["bn_beta"][None, :]
    hprelu = jnp.where(hn >= 0.0, hn, params["prelu_a"] * hn)
    z = jnp.sum(hprelu * params["fc2_w"][None, :], axis=1, keepdims=True) + params["fc2_b"][None, :]
    return 1.0 / (1.0 + jnp.exp(-z))


# --------------------------- deterministic params (mirrors init_weights) ---------------------------
def _xavier_normal(key, shape, fan_in, fan_out):
    std = (2.0 / (fan_in + fan_out)) ** 0.5
    return std * jax.random.normal(key, shape, dtype=jnp.float32)


def make_params(key):
    ks = jax.random.split(key, 7)
    return {
        # Conv2d(1, 8, 3, padding=1): xavier_normal_ weight, normal_ bias (CIN=1 folded away)
        "conv_w": _xavier_normal(ks[0], (KH, KW, COUT), CIN * KH * KW, COUT * KH * KW),
        "conv_b": jax.random.normal(ks[1], (COUT,), jnp.float32),
        # Linear(512, 16): weight stored as (FEAT, HID) in NCHW-flatten row order.
        # (A real PyTorch checkpoint stores (HID, FEAT); transpose when importing.)
        "fc1_w": _xavier_normal(ks[2], (FEAT, HID), FEAT, HID),
        "fc1_b": jax.random.normal(ks[3], (HID,), jnp.float32),
        # BatchNorm1d(16): weight ~ N(1, 0.02), bias = 0
        "bn_gamma": 1.0 + 0.02 * jax.random.normal(ks[4], (HID,), jnp.float32),
        "bn_beta": jnp.zeros((HID,), jnp.float32),
        # PReLU default init (init_weights does not touch it)
        "prelu_a": jnp.array(0.25, jnp.float32),
        # Linear(16, 1): xavier_normal_ weight, normal_ bias
        "fc2_w": _xavier_normal(ks[5], (HID,), HID, 1),
        "fc2_b": jax.random.normal(ks[6], (1,), jnp.float32),
    }


if __name__ == "__main__":
    root = jax.random.PRNGKey(0)
    k_x, k_p = jax.random.split(root)
    x = jax.random.normal(k_x, (N, CIN, H, W), dtype=jnp.float32)   # NCHW, like PyTorch
    params = make_params(k_p)

    out = jax.jit(cnn_forward)(x, params)
    out = jax.block_until_ready(out)

    ref = cnn_forward_ref(x, params)
    assert out.shape == (N, 1), out.shape
    assert jnp.allclose(out, ref, atol=2e-4, rtol=2e-4), (out, ref)
    print("KERNEL_OK")
</pallas_src>

<mosaic_0001>
module attributes {stable_mosaic.version = 11 : i64} {
  func.func @cnn_fused_kernel(%arg0: i32, %arg1: memref<9x8x64xf32, #tpu.memory_space<vmem>>, %arg2: memref<72xf32, #tpu.memory_space<smem>>, %arg3: memref<8xf32, #tpu.memory_space<smem>>, %arg4: memref<512x16xf32, #tpu.memory_space<vmem>>, %arg5: memref<1x16xf32, #tpu.memory_space<vmem>>, %arg6: memref<1x16xf32, #tpu.memory_space<vmem>>, %arg7: memref<1x16xf32, #tpu.memory_space<vmem>>, %arg8: memref<1xf32, #tpu.memory_space<smem>>, %arg9: memref<1x16xf32, #tpu.memory_space<vmem>>, %arg10: memref<1xf32, #tpu.memory_space<smem>>, %arg11: memref<2x1xf32, #tpu.memory_space<vmem>>) attributes {dimension_semantics = [#tpu.dimension_semantics<arbitrary>], iteration_bounds = array<i64: 1>, scalar_prefetch = 0 : i64, scratch_operands = 0 : i64, tpu.core_type = #tpu.core_type<tc>, window_params = [{pipeline_mode = #tpu.pipeline_mode<synchronous>, transform_indices = @transform_0, window_bounds = array<i64: 9, 8, 64>}, {transform_indices = @transform_1, window_bounds = array<i64: 72>}, {transform_indices = @transform_2, window_bounds = array<i64: 8>}, {pipeline_mode = #tpu.pipeline_mode<synchronous>, transform_indices = @transform_3, window_bounds = array<i64: 512, 16>}, {pipeline_mode = #tpu.pipeline_mode<synchronous>, transform_indices = @transform_4, window_bounds = array<i64: 1, 16>}, {pipeline_mode = #tpu.pipeline_mode<synchronous>, transform_indices = @transform_5, window_bounds = array<i64: 1, 16>}, {pipeline_mode = #tpu.pipeline_mode<synchronous>, transform_indices = @transform_6, window_bounds = array<i64: 1, 16>}, {transform_indices = @transform_7, window_bounds = array<i64: 1>}, {pipeline_mode = #tpu.pipeline_mode<synchronous>, transform_indices = @transform_8, window_bounds = array<i64: 1, 16>}, {transform_indices = @transform_9, window_bounds = array<i64: 1>}, {pipeline_mode = #tpu.pipeline_mode<synchronous>, transform_indices = @transform_10, window_bounds = array<i64: 2, 1>}]} {
    %c0 = arith.constant 0 : index
    %c0_0 = arith.constant 0 : index
    %c0_1 = arith.constant 0 : index
    %0 = vector.load %arg1[%c0, %c0_0, %c0_1] : memref<9x8x64xf32, #tpu.memory_space<vmem>>, vector<1x8x64xf32>
    %1 = vector.shape_cast %0 : vector<1x8x64xf32> to vector<8x64xf32>
    %c0_2 = arith.constant 0 : index
    %2 = memref.load %arg2[%c0_2] : memref<72xf32, #tpu.memory_space<smem>>
    %3 = vector.broadcast %2 : f32 to vector<8x64xf32>
    %4 = arith.mulf %1, %3 : vector<8x64xf32>
    %c1 = arith.constant 1 : index
    %5 = memref.load %arg2[%c1] : memref<72xf32, #tpu.memory_space<smem>>
    %6 = vector.broadcast %5 : f32 to vector<8x64xf32>
    %7 = arith.mulf %1, %6 : vector<8x64xf32>
    %c2 = arith.constant 2 : index
    %8 = memref.load %arg2[%c2] : memref<72xf32, #tpu.memory_space<smem>>
    %9 = vector.broadcast %8 : f32 to vector<8x64xf32>
    %10 = arith.mulf %1, %9 : vector<8x64xf32>
    %c3 = arith.constant 3 : index
    %11 = memref.load %arg2[%c3] : memref<72xf32, #tpu.memory_space<smem>>
    %12 = vector.broadcast %11 : f32 to vector<8x64xf32>
    %13 = arith.mulf %1, %12 : vector<8x64xf32>
    %c4 = arith.constant 4 : index
    %14 = memref.load %arg2[%c4] : memref<72xf32, #tpu.memory_space<smem>>
    %15 = vector.broadcast %14 : f32 to vector<8x64xf32>
    %16 = arith.mulf %1, %15 : vector<8x64xf32>
    %c5 = arith.constant 5 : index
    %17 = memref.load %arg2[%c5] : memref<72xf32, #tpu.memory_space<smem>>
    %18 = vector.broadcast %17 : f32 to vector<8x64xf32>
    %19 = arith.mulf %1, %18 : vector<8x64xf32>
    %c6 = arith.constant 6 : index
    %20 = memref.load %arg2[%c6] : memref<72xf32, #tpu.memory_space<smem>>
    %21 = vector.broadcast %20 : f32 to vector<8x64xf32>
    %22 = arith.mulf %1, %21 : vector<8x64xf32>
    %c7 = arith.constant 7 : index
    %23 = memref.load %arg2[%c7] : memref<72xf32, #tpu.memory_space<smem>>
    %24 = vector.broadcast %23 : f32 to vector<8x64xf32>
    %25 = arith.mulf %1, %24 : vector<8x64xf32>
    %c1_3 = arith.constant 1 : index
    %c0_4 = arith.constant 0 : index
    %c0_5 = arith.constant 0 : index
    %26 = vector.load %arg1[%c1_3, %c0_4, %c0_5] : memref<9x8x64xf32, #tpu.memory_space<vmem>>, vector<1x8x64xf32>
    %27 = vector.shape_cast %26 : vector<1x8x64xf32> to vector<8x64xf32>
    %c8 = arith.constant 8 : index
    %28 = memref.load %arg2[%c8] : memref<72xf32, #tpu.memory_space<smem>>
    %29 = vector.broadcast %28 : f32 to vector<8x64xf32>
    %30 = arith.mulf %27, %29 : vector<8x64xf32>
    %31 = arith.addf %4, %30 : vector<8x64xf32>
    %c9 = arith.constant 9 : index
    %32 = memref.load %arg2[%c9] : memref<72xf32, #tpu.memory_space<smem>>
    %33 = vector.broadcast %32 : f32 to vector<8x64xf32>
    %34 = arith.mulf %27, %33 : vector<8x64xf32>
    %35 = arith.addf %7, %34 : vector<8x64xf32>
    %c10 = arith.constant 10 : index
    %36 = memref.load %arg2[%c10] : memref<72xf32, #tpu.memory_space<smem>>
    %37 = vector.broadcast %36 : f32 to vector<8x64xf32>
    %38 = arith.mulf %27, %37 : vector<8x64xf32>
    %39 = arith.addf %10, %38 : vector<8x64xf32>
    %c11 = arith.constant 11 : index
    %40 = memref.load %arg2[%c11] : memref<72xf32, #tpu.memory_space<smem>>
    %41 = vector.broadcast %40 : f32 to vector<8x64xf32>
    %42 = arith.mulf %27, %41 : vector<8x64xf32>
    %43 = arith.addf %13, %42 : vector<8x64xf32>
    %c12 = arith.constant 12 : index
    %44 = memref.load %arg2[%c12] : memref<72xf32, #tpu.memory_space<smem>>
    %45 = vector.broadcast %44 : f32 to vector<8x64xf32>
    %46 = arith.mulf %27, %45 : vector<8x64xf32>
    %47 = arith.addf %16, %46 : vector<8x64xf32>
    %c13 = arith.constant 13 : index
    %48 = memref.load %arg2[%c13] : memref<72xf32, #tpu.memory_space<smem>>
    %49 = vector.broadcast %48 : f32 to vector<8x64xf32>
    %50 = arith.mulf %27, %49 : vector<8x64xf32>
    %51 = arith.addf %19, %50 : vector<8x64xf32>
    %c14 = arith.constant 14 : index
    %52 = memref.load %arg2[%c14] : memref<72xf32, #tpu.memory_space<smem>>
    %53 = vector.broadcast %52 : f32 to vector<8x64xf32>
    %54 = arith.mulf %27, %53 : vector<8x64xf32>
    %55 = arith.addf %22, %54 : vector<8x64xf32>
    %c15 = arith.constant 15 : index
    %56 = memref.load %arg2[%c15] : memref<72xf32, #tpu.memory_space<smem>>
    %57 = vector.broadcast %56 : f32 to vector<8x64xf32>
    %58 = arith.mulf %27, %57 : vector<8x64xf32>
    %59 = arith.addf %25, %58 : vector<8x64xf32>
    %c2_6 = arith.constant 2 : index
    %c0_7 = arith.constant 0 : index
    %c0_8 = arith.constant 0 : index
    %60 = vector.load %arg1[%c2_6, %c0_7, %c0_8] : memref<9x8x64xf32, #tpu.memory_space<vmem>>, vector<1x8x64xf32>
    %61 = vector.shape_cast %60 : vector<1x8x64xf32> to vector<8x64xf32>
    %c16 = arith.constant 16 : index
    %62 = memref.load %arg2[%c16] : memref<72xf32, #tpu.memory_space<smem>>
    %63 = vector.broadcast %62 : f32 to vector<8x64xf32>
    %64 = arith.mulf %61, %63 : vector<8x64xf32>
    %65 = arith.addf %31, %64 : vector<8x64xf32>
    %c17 = arith.constant 17 : index
    %66 = memref.load %arg2[%c17] : memref<72xf32, #tpu.memory_space<smem>>
    %67 = vector.broadcast %66 : f32 to vector<8x64xf32>
    %68 = arith.mulf %61, %67 : vector<8x64xf32>
    %69 = arith.addf %35, %68 : vector<8x64xf32>
    %c18 = arith.constant 18 : index
    %70 = memref.load %arg2[%c18] : memref<72xf32, #tpu.memory_space<smem>>
    %71 = vector.broadcast %70 : f32 to vector<8x64xf32>
    %72 = arith.mulf %61, %71 : vector<8x64xf32>
    %73 = arith.addf %39, %72 : vector<8x64xf32>
    %c19 = arith.constant 19 : index
    %74 = memref.load %arg2[%c19] : memref<72xf32, #tpu.memory_space<smem>>
    %75 = vector.broadcast %74 : f32 to vector<8x64xf32>
    %76 = arith.mulf %61, %75 : vector<8x64xf32>
    %77 = arith.addf %43, %76 : vector<8x64xf32>
    %c20 = arith.constant 20 : index
    %78 = memref.load %arg2[%c20] : memref<72xf32, #tpu.memory_space<smem>>
    %79 = vector.broadcast %78 : f32 to vector<8x64xf32>
    %80 = arith.mulf %61, %79 : vector<8x64xf32>
    %81 = arith.addf %47, %80 : vector<8x64xf32>
    %c21 = arith.constant 21 : index
    %82 = memref.load %arg2[%c21] : memref<72xf32, #tpu.memory_space<smem>>
    %83 = vector.broadcast %82 : f32 to vector<8x64xf32>
    %84 = arith.mulf %61, %83 : vector<8x64xf32>
    %85 = arith.addf %51, %84 : vector<8x64xf32>
    %c22 = arith.constant 22 : index
    %86 = memref.load %arg2[%c22] : memref<72xf32, #tpu.memory_space<smem>>
    %87 = vector.broadcast %86 : f32 to vector<8x64xf32>
    %88 = arith.mulf %61, %87 : vector<8x64xf32>
    %89 = arith.addf %55, %88 : vector<8x64xf32>
    %c23 = arith.constant 23 : index
    %90 = memref.load %arg2[%c23] : memref<72xf32, #tpu.memory_space<smem>>
    %91 = vector.broadcast %90 : f32 to vector<8x64xf32>
    %92 = arith.mulf %61, %91 : vector<8x64xf32>
    %93 = arith.addf %59, %92 : vector<8x64xf32>
    %c3_9 = arith.constant 3 : index
    %c0_10 = arith.constant 0 : index
    %c0_11 = arith.constant 0 : index
    %94 = vector.load %arg1[%c3_9, %c0_10, %c0_11] : memref<9x8x64xf32, #tpu.memory_space<vmem>>, vector<1x8x64xf32>
    %95 = vector.shape_cast %94 : vector<1x8x64xf32> to vector<8x64xf32>
    %c24 = arith.constant 24 : index
    %96 = memref.load %arg2[%c24] : memref<72xf32, #tpu.memory_space<smem>>
    %97 = vector.broadcast %96 : f32 to vector<8x64xf32>
    %98 = arith.mulf %95, %97 : vector<8x64xf32>
    %99 = arith.addf %65, %98 : vector<8x64xf32>
    %c25 = arith.constant 25 : index
    %100 = memref.load %arg2[%c25] : memref<72xf32, #tpu.memory_space<smem>>
    %101 = vector.broadcast %100 : f32 to vector<8x64xf32>
    %102 = arith.mulf %95, %101 : vector<8x64xf32>
    %103 = arith.addf %69, %102 : vector<8x64xf32>
    %c26 = arith.constant 26 : index
    %104 = memref.load %arg2[%c26] : memref<72xf32, #tpu.memory_space<smem>>
    %105 = vector.broadcast %104 : f32 to vector<8x64xf32>
    %106 = arith.mulf %95, %105 : vector<8x64xf32>
    %107 = arith.addf %73, %106 : vector<8x64xf32>
    %c27 = arith.constant 27 : index
    %108 = memref.load %arg2[%c27] : memref<72xf32, #tpu.memory_space<smem>>
    %109 = vector.broadcast %108 : f32 to vector<8x64xf32>
    %110 = arith.mulf %95, %109 : vector<8x64xf32>
    %111 = arith.addf %77, %110 : vector<8x64xf32>
    %c28 = arith.constant 28 : index
    %112 = memref.load %arg2[%c28] : memref<72xf32, #tpu.memory_space<smem>>
    %113 = vector.broadcast %112 : f32 to vector<8x64xf32>
    %114 = arith.mulf %95, %113 : vector<8x64xf32>
    %115 = arith.addf %81, %114 : vector<8x64xf32>
    %c29 = arith.constant 29 : index
    %116 = memref.load %arg2[%c29] : memref<72xf32, #tpu.memory_space<smem>>
    %117 = vector.broadcast %116 : f32 to vector<8x64xf32>
    %118 = arith.mulf %95, %117 : vector<8x64xf32>
    %119 = arith.addf %85, %118 : vector<8x64xf32>
    %c30 = arith.constant 30 : index
    %120 = memref.load %arg2[%c30] : memref<72xf32, #tpu.memory_space<smem>>
    %121 = vector.broadcast %120 : f32 to vector<8x64xf32>
    %122 = arith.mulf %95, %121 : vector<8x64xf32>
    %123 = arith.addf %89, %122 : vector<8x64xf32>
    %c31 = arith.constant 31 : index
    %124 = memref.load %arg2[%c31] : memref<72xf32, #tpu.memory_space<smem>>
    %125 = vector.broadcast %124 : f32 to vector<8x64xf32>
    %126 = arith.mulf %95, %125 : vector<8x64xf32>
    %127 = arith.addf %93, %126 : vector<8x64xf32>
    %c4_12 = arith.constant 4 : index
    %c0_13 = arith.constant 0 : index
    %c0_14 = arith.constant 0 : index
    %128 = vector.load %arg1[%c4_12, %c0_13, %c0_14] : memref<9x8x64xf32, #tpu.memory_space<vmem>>, vector<1x8x64xf32>
    %129 = vector.shape_cast %128 : vector<1x8x64xf32> to vector<8x64xf32>
    %c32 = arith.constant 32 : index
    %130 = memref.load %arg2[%c32] : memref<72xf32, #tpu.memory_space<smem>>
    %131 = vector.broadcast %130 : f32 to vector<8x64xf32>
    %132 = arith.mulf %129, %131 : vector<8x64xf32>
    %133 = arith.addf %99, %132 : vector<8x64xf32>
    %c33 = arith.constant 33 : index
    %134 = memref.load %arg2[%c33] : memref<72xf32, #tpu.memory_space<smem>>
    %135 = vector.broadcast %134 : f32 to vector<8x64xf32>
    %136 = arith.mulf %129, %135 : vector<8x64xf32>
    %137 = arith.addf %103, %136 : vector<8x64xf32>
    %c34 = arith.constant 34 : index
    %138 = memref.load %arg2[%c34] : memref<72xf32, #tpu.memory_space<smem>>
    %139 = vector.broadcast %138 : f32 to vector<8x64xf32>
    %140 = arith.mulf %129, %139 : vector<8x64xf32>
    %141 = arith.addf %107, %140 : vector<8x64xf32>
    %c35 = arith.constant 35 : index
    %142 = memref.load %arg2[%c35] : memref<72xf32, #tpu.memory_space<smem>>
    %143 = vector.broadcast %142 : f32 to vector<8x64xf32>
    %144 = arith.mulf %129, %143 : vector<8x64xf32>
    %145 = arith.addf %111, %144 : vector<8x64xf32>
    %c36 = arith.constant 36 : index
    %146 = memref.load %arg2[%c36] : memref<72xf32, #tpu.memory_space<smem>>
    %147 = vector.broadcast %146 : f32 to vector<8x64xf32>
    %148 = arith.mulf %129, %147 : vector<8x64xf32>
    %149 = arith.addf %115, %148 : vector<8x64xf32>
    %c37 = arith.constant 37 : index
    %150 = memref.load %arg2[%c37] : memref<72xf32, #tpu.memory_space<smem>>
    %151 = vector.broadcast %150 : f32 to vector<8x64xf32>
    %152 = arith.mulf %129, %151 : vector<8x64xf32>
    %153 = arith.addf %119, %152 : vector<8x64xf32>
    %c38 = arith.constant 38 : index
    %154 = memref.load %arg2[%c38] : memref<72xf32, #tpu.memory_space<smem>>
    %155 = vector.broadcast %154 : f32 to vector<8x64xf32>
    %156 = arith.mulf %129, %155 : vector<8x64xf32>
    %157 = arith.addf %123, %156 : vector<8x64xf32>
    %c39 = arith.constant 39 : index
    %158 = memref.load %arg2[%c39] : memref<72xf32, #tpu.memory_space<smem>>
    %159 = vector.broadcast %158 : f32 to vector<8x64xf32>
    %160 = arith.mulf %129, %159 : vector<8x64xf32>
    %161 = arith.addf %127, %160 : vector<8x64xf32>
    %c5_15 = arith.constant 5 : index
    %c0_16 = arith.constant 0 : index
    %c0_17 = arith.constant 0 : index
    %162 = vector.load %arg1[%c5_15, %c0_16, %c0_17] : memref<9x8x64xf32, #tpu.memory_space<vmem>>, vector<1x8x64xf32>
    %163 = vector.shape_cast %162 : vector<1x8x64xf32> to vector<8x64xf32>
    %c40 = arith.constant 40 : index
    %164 = memref.load %arg2[%c40] : memref<72xf32, #tpu.memory_space<smem>>
    %165 = vector.broadcast %164 : f32 to vector<8x64xf32>
    %166 = arith.mulf %163, %165 : vector<8x64xf32>
    %167 = arith.addf %133, %166 : vector<8x64xf32>
    %c41 = arith.constant 41 : index
    %168 = memref.load %arg2[%c41] : memref<72xf32, #tpu.memory_space<smem>>
    %169 = vector.broadcast %168 : f32 to vector<8x64xf32>
    %170 = arith.mulf %163, %169 : vector<8x64xf32>
    %171 = arith.addf %137, %170 : vector<8x64xf32>
    %c42 = arith.constant 42 : index
    %172 = memref.load %arg2[%c42] : memref<72xf32, #tpu.memory_space<smem>>
    %173 = vector.broadcast %172 : f32 to vector<8x64xf32>
    %174 = arith.mulf %163, %173 : vector<8x64xf32>
    %175 = arith.addf %141, %174 : vector<8x64xf32>
    %c43 = arith.constant 43 : index
    %176 = memref.load %arg2[%c43] : memref<72xf32, #tpu.memory_space<smem>>
    %177 = vector.broadcast %176 : f32 to vector<8x64xf32>
    %178 = arith.mulf %163, %177 : vector<8x64xf32>
    %179 = arith.addf %145, %178 : vector<8x64xf32>
    %c44 = arith.constant 44 : index
    %180 = memref.load %arg2[%c44] : memref<72xf32, #tpu.memory_space<smem>>
    %181 = vector.broadcast %180 : f32 to vector<8x64xf32>
    %182 = arith.mulf %163, %181 : vector<8x64xf32>
    %183 = arith.addf %149, %182 : vector<8x64xf32>
    %c45 = arith.constant 45 : index
    %184 = memref.load %arg2[%c45] : memref<72xf32, #tpu.memory_space<smem>>
    %185 = vector.broadcast %184 : f32 to vector<8x64xf32>
    %186 = arith.mulf %163, %185 : vector<8x64xf32>
    %187 = arith.addf %153, %186 : vector<8x64xf32>
    %c46 = arith.constant 46 : index
    %188 = memref.load %arg2[%c46] : memref<72xf32, #tpu.memory_space<smem>>
    %189 = vector.broadcast %188 : f32 to vector<8x64xf32>
    %190 = arith.mulf %163, %189 : vector<8x64xf32>
    %191 = arith.addf %157, %190 : vector<8x64xf32>
    %c47 = arith.constant 47 : index
    %192 = memref.load %arg2[%c47] : memref<72xf32, #tpu.memory_space<smem>>
    %193 = vector.broadcast %192 : f32 to vector<8x64xf32>
    %194 = arith.mulf %163, %193 : vector<8x64xf32>
    %195 = arith.addf %161, %194 : vector<8x64xf32>
    %c6_18 = arith.constant 6 : index
    %c0_19 = arith.constant 0 : index
    %c0_20 = arith.constant 0 : index
    %196 = vector.load %arg1[%c6_18, %c0_19, %c0_20] : memref<9x8x64xf32, #tpu.memory_space<vmem>>, vector<1x8x64xf32>
    %197 = vector.shape_cast %196 : vector<1x8x64xf32> to vector<8x64xf32>
    %c48 = arith.constant 48 : index
    %198 = memref.load %arg2[%c48] : memref<72xf32, #tpu.memory_space<smem>>
    %199 = vector.broadcast %198 : f32 to vector<8x64xf32>
    %200 = arith.mulf %197, %199 : vector<8x64xf32>
    %201 = arith.addf %167, %200 : vector<8x64xf32>
    %c49 = arith.constant 49 : index
    %202 = memref.load %arg2[%c49] : memref<72xf32, #tpu.memory_space<smem>>
    %203 = vector.broadcast %202 : f32 to vector<8x64xf32>
    %204 = arith.mulf %197, %203 : vector<8x64xf32>
    %205 = arith.addf %171, %204 : vector<8x64xf32>
    %c50 = arith.constant 50 : index
    %206 = memref.load %arg2[%c50] : memref<72xf32, #tpu.memory_space<smem>>
    %207 = vector.broadcast %206 : f32 to vector<8x64xf32>
    %208 = arith.mulf %197, %207 : vector<8x64xf32>
    %209 = arith.addf %175, %208 : vector<8x64xf32>
    %c51 = arith.constant 51 : index
    %210 = memref.load %arg2[%c51] : memref<72xf32, #tpu.memory_space<smem>>
    %211 = vector.broadcast %210 : f32 to vector<8x64xf32>
    %212 = arith.mulf %197, %211 : vector<8x64xf32>
    %213 = arith.addf %179, %212 : vector<8x64xf32>
    %c52 = arith.constant 52 : index
    %214 = memref.load %arg2[%c52] : memref<72xf32, #tpu.memory_space<smem>>
    %215 = vector.broadcast %214 : f32 to vector<8x64xf32>
    %216 = arith.mulf %197, %215 : vector<8x64xf32>
    %217 = arith.addf %183, %216 : vector<8x64xf32>
    %c53 = arith.constant 53 : index
    %218 = memref.load %arg2[%c53] : memref<72xf32, #tpu.memory_space<smem>>
    %219 = vector.broadcast %218 : f32 to vector<8x64xf32>
    %220 = arith.mulf %197, %219 : vector<8x64xf32>
    %221 = arith.addf %187, %220 : vector<8x64xf32>
    %c54 = arith.constant 54 : index
    %222 = memref.load %arg2[%c54] : memref<72xf32, #tpu.memory_space<smem>>
    %223 = vector.broadcast %222 : f32 to vector<8x64xf32>
    %224 = arith.mulf %197, %223 : vector<8x64xf32>
    %225 = arith.addf %191, %224 : vector<8x64xf32>
    %c55 = arith.constant 55 : index
    %226 = memref.load %arg2[%c55] : memref<72xf32, #tpu.memory_space<smem>>
    %227 = vector.broadcast %226 : f32 to vector<8x64xf32>
    %228 = arith.mulf %197, %227 : vector<8x64xf32>
    %229 = arith.addf %195, %228 : vector<8x64xf32>
    %c7_21 = arith.constant 7 : index
    %c0_22 = arith.constant 0 : index
    %c0_23 = arith.constant 0 : index
    %230 = vector.load %arg1[%c7_21, %c0_22, %c0_23] : memref<9x8x64xf32, #tpu.memory_space<vmem>>, vector<1x8x64xf32>
    %231 = vector.shape_cast %230 : vector<1x8x64xf32> to vector<8x64xf32>
    %c56 = arith.constant 56 : index
    %232 = memref.load %arg2[%c56] : memref<72xf32, #tpu.memory_space<smem>>
    %233 = vector.broadcast %232 : f32 to vector<8x64xf32>
    %234 = arith.mulf %231, %233 : vector<8x64xf32>
    %235 = arith.addf %201, %234 : vector<8x64xf32>
    %c57 = arith.constant 57 : index
    %236 = memref.load %arg2[%c57] : memref<72xf32, #tpu.memory_space<smem>>
    %237 = vector.broadcast %236 : f32 to vector<8x64xf32>
    %238 = arith.mulf %231, %237 : vector<8x64xf32>
    %239 = arith.addf %205, %238 : vector<8x64xf32>
    %c58 = arith.constant 58 : index
    %240 = memref.load %arg2[%c58] : memref<72xf32, #tpu.memory_space<smem>>
    %241 = vector.broadcast %240 : f32 to vector<8x64xf32>
    %242 = arith.mulf %231, %241 : vector<8x64xf32>
    %243 = arith.addf %209, %242 : vector<8x64xf32>
    %c59 = arith.constant 59 : index
    %244 = memref.load %arg2[%c59] : memref<72xf32, #tpu.memory_space<smem>>
    %245 = vector.broadcast %244 : f32 to vector<8x64xf32>
    %246 = arith.mulf %231, %245 : vector<8x64xf32>
    %247 = arith.addf %213, %246 : vector<8x64xf32>
    %c60 = arith.constant 60 : index
    %248 = memref.load %arg2[%c60] : memref<72xf32, #tpu.memory_space<smem>>
    %249 = vector.broadcast %248 : f32 to vector<8x64xf32>
    %250 = arith.mulf %231, %249 : vector<8x64xf32>
    %251 = arith.addf %217, %250 : vector<8x64xf32>
    %c61 = arith.constant 61 : index
    %252 = memref.load %arg2[%c61] : memref<72xf32, #tpu.memory_space<smem>>
    %253 = vector.broadcast %252 : f32 to vector<8x64xf32>
    %254 = arith.mulf %231, %253 : vector<8x64xf32>
    %255 = arith.addf %221, %254 : vector<8x64xf32>
    %c62 = arith.constant 62 : index
    %256 = memref.load %arg2[%c62] : memref<72xf32, #tpu.memory_space<smem>>
    %257 = vector.broadcast %256 : f32 to vector<8x64xf32>
    %258 = arith.mulf %231, %257 : vector<8x64xf32>
    %259 = arith.addf %225, %258 : vector<8x64xf32>
    %c63 = arith.constant 63 : index
    %260 = memref.load %arg2[%c63] : memref<72xf32, #tpu.memory_space<smem>>
    %261 = vector.broadcast %260 : f32 to vector<8x64xf32>
    %262 = arith.mulf %231, %261 : vector<8x64xf32>
    %263 = arith.addf %229, %262 : vector<8x64xf32>
    %c8_24 = arith.constant 8 : index
    %c0_25 = arith.constant 0 : index
    %c0_26 = arith.constant 0 : index
    %264 = vector.load %arg1[%c8_24, %c0_25, %c0_26] : memref<9x8x64xf32, #tpu.memory_space<vmem>>, vector<1x8x64xf32>
    %265 = vector.shape_cast %264 : vector<1x8x64xf32> to vector<8x64xf32>
    %c64 = arith.constant 64 : index
    %266 = memref.load %arg2[%c64] : memref<72xf32, #tpu.memory_space<smem>>
    %267 = vector.broadcast %266 : f32 to vector<8x64xf32>
    %268 = arith.mulf %265, %267 : vector<8x64xf32>
    %269 = arith.addf %235, %268 : vector<8x64xf32>
    %c65 = arith.constant 65 : index
    %270 = memref.load %arg2[%c65] : memref<72xf32, #tpu.memory_space<smem>>
    %271 = vector.broadcast %270 : f32 to vector<8x64xf32>
    %272 = arith.mulf %265, %271 : vector<8x64xf32>
    %273 = arith.addf %239, %272 : vector<8x64xf32>
    %c66 = arith.constant 66 : index
    %274 = memref.load %arg2[%c66] : memref<72xf32, #tpu.memory_space<smem>>
    %275 = vector.broadcast %274 : f32 to vector<8x64xf32>
    %276 = arith.mulf %265, %275 : vector<8x64xf32>
    %277 = arith.addf %243, %276 : vector<8x64xf32>
    %c67 = arith.constant 67 : index
    %278 = memref.load %arg2[%c67] : memref<72xf32, #tpu.memory_space<smem>>
    %279 = vector.broadcast %278 : f32 to vector<8x64xf32>
    %280 = arith.mulf %265, %279 : vector<8x64xf32>
    %281 = arith.addf %247, %280 : vector<8x64xf32>
    %c68 = arith.constant 68 : index
    %282 = memref.load %arg2[%c68] : memref<72xf32, #tpu.memory_space<smem>>
    %283 = vector.broadcast %282 : f32 to vector<8x64xf32>
    %284 = arith.mulf %265, %283 : vector<8x64xf32>
    %285 = arith.addf %251, %284 : vector<8x64xf32>
    %c69 = arith.constant 69 : index
    %286 = memref.load %arg2[%c69] : memref<72xf32, #tpu.memory_space<smem>>
    %287 = vector.broadcast %286 : f32 to vector<8x64xf32>
    %288 = arith.mulf %265, %287 : vector<8x64xf32>
    %289 = arith.addf %255, %288 : vector<8x64xf32>
    %c70 = arith.constant 70 : index
    %290 = memref.load %arg2[%c70] : memref<72xf32, #tpu.memory_space<smem>>
    %291 = vector.broadcast %290 : f32 to vector<8x64xf32>
    %292 = arith.mulf %265, %291 : vector<8x64xf32>
    %293 = arith.addf %259, %292 : vector<8x64xf32>
    %c71 = arith.constant 71 : index
    %294 = memref.load %arg2[%c71] : memref<72xf32, #tpu.memory_space<smem>>
    %295 = vector.broadcast %294 : f32 to vector<8x64xf32>
    %296 = arith.mulf %265, %295 : vector<8x64xf32>
    %297 = arith.addf %263, %296 : vector<8x64xf32>
    %c0_27 = arith.constant 0 : index
    %298 = memref.load %arg3[%c0_27] : memref<8xf32, #tpu.memory_space<smem>>
    %299 = vector.broadcast %298 : f32 to vector<8x64xf32>
    %300 = arith.addf %269, %299 : vector<8x64xf32>
    %cst = arith.constant 0.000000e+00 : f32
    %301 = vector.broadcast %cst : f32 to vector<8x64xf32>
    %302 = arith.maximumf %300, %301 : vector<8x64xf32>
    %c4_i32 = arith.constant 4 : i32
    %303 = tpu.dynamic_rotate %302 by %c4_i32 dim 0 : vector<8x64xf32>, i32 -> vector<8x64xf32>
    %304 = arith.maximumf %302, %303 : vector<8x64xf32>
    %c2_i32 = arith.constant 2 : i32
    %305 = tpu.dynamic_rotate %304 by %c2_i32 dim 0 : vector<8x64xf32>, i32 -> vector<8x64xf32>
    %306 = arith.maximumf %304, %305 : vector<8x64xf32>
    %c1_28 = arith.constant 1 : index
    %307 = memref.load %arg3[%c1_28] : memref<8xf32, #tpu.memory_space<smem>>
    %308 = vector.broadcast %307 : f32 to vector<8x64xf32>
    %309 = arith.addf %273, %308 : vector<8x64xf32>
    %cst_29 = arith.constant 0.000000e+00 : f32
    %310 = vector.broadcast %cst_29 : f32 to vector<8x64xf32>
    %311 = arith.maximumf %309, %310 : vector<8x64xf32>
    %c4_i32_30 = arith.constant 4 : i32
    %312 = tpu.dynamic_rotate %311 by %c4_i32_30 dim 0 : vector<8x64xf32>, i32 -> vector<8x64xf32>
    %313 = arith.maximumf %311, %312 : vector<8x64xf32>
    %c2_i32_31 = arith.constant 2 : i32
    %314 = tpu.dynamic_rotate %313 by %c2_i32_31 dim 0 : vector<8x64xf32>, i32 -> vector<8x64xf32>
    %315 = arith.maximumf %313, %314 : vector<8x64xf32>
    %c2_32 = arith.constant 2 : index
    %316 = memref.load %arg3[%c2_32] : memref<8xf32, #tpu.memory_space<smem>>
    %317 = vector.broadcast %316 : f32 to vector<8x64xf32>
    %318 = arith.addf %277, %317 : vector<8x64xf32>
    %cst_33 = arith.constant 0.000000e+00 : f32
    %319 = vector.broadcast %cst_33 : f32 to vector<8x64xf32>
    %320 = arith.maximumf %318, %319 : vector<8x64xf32>
    %c4_i32_34 = arith.constant 4 : i32
    %321 = tpu.dynamic_rotate %320 by %c4_i32_34 dim 0 : vector<8x64xf32>, i32 -> vector<8x64xf32>
    %322 = arith.maximumf %320, %321 : vector<8x64xf32>
    %c2_i32_35 = arith.constant 2 : i32
    %323 = tpu.dynamic_rotate %322 by %c2_i32_35 dim 0 : vector<8x64xf32>, i32 -> vector<8x64xf32>
    %324 = arith.maximumf %322, %323 : vector<8x64xf32>
    %c3_36 = arith.constant 3 : index
    %325 = memref.load %arg3[%c3_36] : memref<8xf32, #tpu.memory_space<smem>>
    %326 = vector.broadcast %325 : f32 to vector<8x64xf32>
    %327 = arith.addf %281, %326 : vector<8x64xf32>
    %cst_37 = arith.constant 0.000000e+00 : f32
    %328 = vector.broadcast %cst_37 : f32 to vector<8x64xf32>
    %329 = arith.maximumf %327, %328 : vector<8x64xf32>
    %c4_i32_38 = arith.constant 4 : i32
    %330 = tpu.dynamic_rotate %329 by %c4_i32_38 dim 0 : vector<8x64xf32>, i32 -> vector<8x64xf32>
    %331 = arith.maximumf %329, %330 : vector<8x64xf32>
    %c2_i32_39 = arith.constant 2 : i32
    %332 = tpu.dynamic_rotate %331 by %c2_i32_39 dim 0 : vector<8x64xf32>, i32 -> vector<8x64xf32>
    %333 = arith.maximumf %331, %332 : vector<8x64xf32>
    %c4_40 = arith.constant 4 : index
    %334 = memref.load %arg3[%c4_40] : memref<8xf32, #tpu.memory_space<smem>>
    %335 = vector.broadcast %334 : f32 to vector<8x64xf32>
    %336 = arith.addf %285, %335 : vector<8x64xf32>
    %cst_41 = arith.constant 0.000000e+00 : f32
    %337 = vector.broadcast %cst_41 : f32 to vector<8x64xf32>
    %338 = arith.maximumf %336, %337 : vector<8x64xf32>
    %c4_i32_42 = arith.constant 4 : i32
    %339 = tpu.dynamic_rotate %338 by %c4_i32_42 dim 0 : vector<8x64xf32>, i32 -> vector<8x64xf32>
    %340 = arith.maximumf %338, %339 : vector<8x64xf32>
    %c2_i32_43 = arith.constant 2 : i32
    %341 = tpu.dynamic_rotate %340 by %c2_i32_43 dim 0 : vector<8x64xf32>, i32 -> vector<8x64xf32>
    %342 = arith.maximumf %340, %341 : vector<8x64xf32>
    %c5_44 = arith.constant 5 : index
    %343 = memref.load %arg3[%c5_44] : memref<8xf32, #tpu.memory_space<smem>>
    %344 = vector.broadcast %343 : f32 to vector<8x64xf32>
    %345 = arith.addf %289, %344 : vector<8x64xf32>
    %cst_45 = arith.constant 0.000000e+00 : f32
    %346 = vector.broadcast %cst_45 : f32 to vector<8x64xf32>
    %347 = arith.maximumf %345, %346 : vector<8x64xf32>
    %c4_i32_46 = arith.constant 4 : i32
    %348 = tpu.dynamic_rotate %347 by %c4_i32_46 dim 0 : vector<8x64xf32>, i32 -> vector<8x64xf32>
    %349 = arith.maximumf %347, %348 : vector<8x64xf32>
    %c2_i32_47 = arith.constant 2 : i32
    %350 = tpu.dynamic_rotate %349 by %c2_i32_47 dim 0 : vector<8x64xf32>, i32 -> vector<8x64xf32>
    %351 = arith.maximumf %349, %350 : vector<8x64xf32>
    %c6_48 = arith.constant 6 : index
    %352 = memref.load %arg3[%c6_48] : memref<8xf32, #tpu.memory_space<smem>>
    %353 = vector.broadcast %352 : f32 to vector<8x64xf32>
    %354 = arith.addf %293, %353 : vector<8x64xf32>
    %cst_49 = arith.constant 0.000000e+00 : f32
    %355 = vector.broadcast %cst_49 : f32 to vector<8x64xf32>
    %356 = arith.maximumf %354, %355 : vector<8x64xf32>
    %c4_i32_50 = arith.constant 4 : i32
    %357 = tpu.dynamic_rotate %356 by %c4_i32_50 dim 0 : vector<8x64xf32>, i32 -> vector<8x64xf32>
    %358 = arith.maximumf %356, %357 : vector<8x64xf32>
    %c2_i32_51 = arith.constant 2 : i32
    %359 = tpu.dynamic_rotate %358 by %c2_i32_51 dim 0 : vector<8x64xf32>, i32 -> vector<8x64xf32>
    %360 = arith.maximumf %358, %359 : vector<8x64xf32>
    %c7_52 = arith.constant 7 : index
    %361 = memref.load %arg3[%c7_52] : memref<8xf32, #tpu.memory_space<smem>>
    %362 = vector.broadcast %361 : f32 to vector<8x64xf32>
    %363 = arith.addf %297, %362 : vector<8x64xf32>
    %cst_53 = arith.constant 0.000000e+00 : f32
    %364 = vector.broadcast %cst_53 : f32 to vector<8x64xf32>
    %365 = arith.maximumf %363, %364 : vector<8x64xf32>
    %c4_i32_54 = arith.constant 4 : i32
    %366 = tpu.dynamic_rotate %365 by %c4_i32_54 dim 0 : vector<8x64xf32>, i32 -> vector<8x64xf32>
    %367 = arith.maximumf %365, %366 : vector<8x64xf32>
    %c2_i32_55 = arith.constant 2 : i32
    %368 = tpu.dynamic_rotate %367 by %c2_i32_55 dim 0 : vector<8x64xf32>, i32 -> vector<8x64xf32>
    %369 = arith.maximumf %367, %368 : vector<8x64xf32>
    %370 = tpu.concatenate %306, %315, %324, %333, %342, %351, %360, %369 in 1 : vector<8x64xf32>, vector<8x64xf32>, vector<8x64xf32>, vector<8x64xf32>, vector<8x64xf32>, vector<8x64xf32>, vector<8x64xf32>, vector<8x64xf32> -> vector<8x512xf32>
    %c0_56 = arith.constant 0 : index
    %c0_57 = arith.constant 0 : index
    %371 = vector.load %arg4[%c0_56, %c0_57] : memref<512x16xf32, #tpu.memory_space<vmem>>, vector<512x16xf32>
    %cst_58 = arith.constant dense<0.000000e+00> : vector<8x16xf32>
    %372 = tpu.matmul %370, %371, %cst_58 {dimension_numbers = #tpu.dot_dimension_numbers<[1], [0], [0], [1], [0, 0, 1, 1], [], []>} : vector<8x512xf32>, vector<512x16xf32>, vector<8x16xf32> -> vector<8x16xf32>
    %373 = vector.extract_strided_slice %372 {offsets = [0, 0], sizes = [2, 16], strides = [1, 1]} : vector<8x16xf32> to vector<2x16xf32>
    %c0_59 = arith.constant 0 : index
    %c0_60 = arith.constant 0 : index
    %374 = vector.load %arg5[%c0_59, %c0_60] : memref<1x16xf32, #tpu.memory_space<vmem>>, vector<1x16xf32>
    %375 = vector.broadcast %374 : vector<1x16xf32> to vector<2x16xf32>
    %376 = arith.addf %373, %375 : vector<2x16xf32>
    %cst_61 = arith.constant dense<0.000000e+00> : vector<16xf32>
    %377 = vector.multi_reduction <add>, %376, %cst_61 [0] : vector<2x16xf32> to vector<16xf32>
    %378 = vector.shape_cast %377 : vector<16xf32> to vector<1x16xf32>
    %cst_62 = arith.constant 2.000000e+00 : f32
    %379 = vector.broadcast %cst_62 : f32 to vector<1x16xf32>
    %380 = arith.divf %378, %379 : vector<1x16xf32>
    %381 = vector.broadcast %380 : vector<1x16xf32> to vector<2x16xf32>
    %382 = arith.subf %376, %381 : vector<2x16xf32>
    %383 = arith.mulf %382, %382 : vector<2x16xf32>
    %cst_63 = arith.constant dense<0.000000e+00> : vector<16xf32>
    %384 = vector.multi_reduction <add>, %383, %cst_63 [0] : vector<2x16xf32> to vector<16xf32>
    %385 = vector.shape_cast %384 : vector<16xf32> to vector<1x16xf32>
    %cst_64 = arith.constant 2.000000e+00 : f32
    %386 = vector.broadcast %cst_64 : f32 to vector<1x16xf32>
    %387 = arith.divf %385, %386 : vector<1x16xf32>
    %388 = vector.broadcast %380 : vector<1x16xf32> to vector<2x16xf32>
    %389 = arith.subf %376, %388 : vector<2x16xf32>
    %cst_65 = arith.constant 9.99999974E-6 : f32
    %390 = vector.broadcast %cst_65 : f32 to vector<1x16xf32>
    %391 = arith.addf %387, %390 : vector<1x16xf32>
    %392 = math.rsqrt %391 : vector<1x16xf32>
    %393 = vector.broadcast %392 : vector<1x16xf32> to vector<2x16xf32>
    %394 = arith.mulf %389, %393 : vector<2x16xf32>
    %c0_66 = arith.constant 0 : index
    %c0_67 = arith.constant 0 : index
    %395 = vector.load %arg6[%c0_66, %c0_67] : memref<1x16xf32, #tpu.memory_space<vmem>>, vector<1x16xf32>
    %396 = vector.broadcast %395 : vector<1x16xf32> to vector<2x16xf32>
    %397 = arith.mulf %394, %396 : vector<2x16xf32>
    %c0_68 = arith.constant 0 : index
    %c0_69 = arith.constant 0 : index
    %398 = vector.load %arg7[%c0_68, %c0_69] : memref<1x16xf32, #tpu.memory_space<vmem>>, vector<1x16xf32>
    %399 = vector.broadcast %398 : vector<1x16xf32> to vector<2x16xf32>
    %400 = arith.addf %397, %399 : vector<2x16xf32>
    %c0_70 = arith.constant 0 : index
    %401 = memref.load %arg8[%c0_70] : memref<1xf32, #tpu.memory_space<smem>>
    %cst_71 = arith.constant 0.000000e+00 : f32
    %402 = vector.broadcast %cst_71 : f32 to vector<2x16xf32>
    %403 = arith.cmpf oge, %400, %402 : vector<2x16xf32>
    %404 = vector.broadcast %401 : f32 to vector<2x16xf32>
    %405 = arith.mulf %404, %400 : vector<2x16xf32>
    %406 = arith.select %403, %400, %405 : vector<2x16xi1>, vector<2x16xf32>
    %c0_72 = arith.constant 0 : index
    %c0_73 = arith.constant 0 : index
    %407 = vector.load %arg9[%c0_72, %c0_73] : memref<1x16xf32, #tpu.memory_space<vmem>>, vector<1x16xf32>
    %408 = vector.broadcast %407 : vector<1x16xf32> to vector<2x16xf32>
    %409 = arith.mulf %406, %408 : vector<2x16xf32>
    %cst_74 = arith.constant dense<0.000000e+00> : vector<2xf32>
    %410 = vector.multi_reduction <add>, %409, %cst_74 [1] : vector<2x16xf32> to vector<2xf32>
    %411 = vector.shape_cast %410 : vector<2xf32> to vector<2x1xf32>
    %c0_75 = arith.constant 0 : index
    %412 = memref.load %arg10[%c0_75] : memref<1xf32, #tpu.memory_space<smem>>
    %413 = vector.broadcast %412 : f32 to vector<2x1xf32>
    %414 = arith.addf %411, %413 : vector<2x1xf32>
    %cst_76 = arith.constant 0.000000e+00 : f32
    %415 = vector.broadcast %cst_76 : f32 to vector<2x1xf32>
    %416 = arith.subf %415, %414 : vector<2x1xf32>
    %417 = math.exp %416 : vector<2x1xf32>
    %cst_77 = arith.constant 1.000000e+00 : f32
    %418 = vector.broadcast %cst_77 : f32 to vector<2x1xf32>
    %419 = arith.addf %418, %417 : vector<2x1xf32>
    %cst_78 = arith.constant 1.000000e+00 : f32
    %420 = vector.broadcast %cst_78 : f32 to vector<2x1xf32>
    %421 = arith.divf %420, %419 : vector<2x1xf32>
    %c0_79 = arith.constant 0 : index
    %c0_80 = arith.constant 0 : index
    %422 = vector.load %arg11[%c0_79, %c0_80] : memref<2x1xf32, #tpu.memory_space<vmem>>, vector<2x1xf32>
    tpu.vector_store %arg11[%c0_79, %c0_80], %421 {strides = array<i32>} : memref<2x1xf32, #tpu.memory_space<vmem>>, vector<2x1xf32>,
    return
  }
  func.func @transform_0(%arg0: i32) -> (i32, i32, i32) {
    %c0_i32 = arith.constant 0 : i32
    %c0_i32_0 = arith.constant 0 : i32
    %c0_i32_1 = arith.constant 0 : i32
    %c0_i32_2 = arith.constant 0 : i32
    return %c0_i32, %c0_i32_0, %c0_i32_1 : i32, i32, i32
  }
  func.func @transform_1(%arg0: i32) -> i32 {
    %c0_i32 = arith.constant 0 : i32
    %c0_i32_0 = arith.constant 0 : i32
    return %c0_i32 : i32
  }
  func.func @transform_2(%arg0: i32) -> i32 {
    %c0_i32 = arith.constant 0 : i32
    %c0_i32_0 = arith.constant 0 : i32
    return %c0_i32 : i32
  }
  func.func @transform_3(%arg0: i32) -> (i32, i32) {
    %c0_i32 = arith.constant 0 : i32
    %c0_i32_0 = arith.constant 0 : i32
    %c0_i32_1 = arith.constant 0 : i32
    return %c0_i32, %c0_i32_0 : i32, i32
  }
  func.func @transform_4(%arg0: i32) -> (i32, i32) {
    %c0_i32 = arith.constant 0 : i32
    %c0_i32_0 = arith.constant 0 : i32
    %c0_i32_1 = arith.constant 0 : i32
    return %c0_i32, %c0_i32_0 : i32, i32
  }
  func.func @transform_5(%arg0: i32) -> (i32, i32) {
    %c0_i32 = arith.constant 0 : i32
    %c0_i32_0 = arith.constant 0 : i32
    %c0_i32_1 = arith.constant 0 : i32
    return %c0_i32, %c0_i32_0 : i32, i32
  }
  func.func @transform_6(%arg0: i32) -> (i32, i32) {
    %c0_i32 = arith.constant 0 : i32
    %c0_i32_0 = arith.constant 0 : i32
    %c0_i32_1 = arith.constant 0 : i32
    return %c0_i32, %c0_i32_0 : i32, i32
  }
  func.func @transform_7(%arg0: i32) -> i32 {
    %c0_i32 = arith.constant 0 : i32
    %c0_i32_0 = arith.constant 0 : i32
    return %c0_i32 : i32
  }
  func.func @transform_8(%arg0: i32) -> (i32, i32) {
    %c0_i32 = arith.constant 0 : i32
    %c0_i32_0 = arith.constant 0 : i32
    %c0_i32_1 = arith.constant 0 : i32
    return %c0_i32, %c0_i32_0 : i32, i32
  }
  func.func @transform_9(%arg0: i32) -> i32 {
    %c0_i32 = arith.constant 0 : i32
    %c0_i32_0 = arith.constant 0 : i32
    return %c0_i32 : i32
  }
  func.func @transform_10(%arg0: i32) -> (i32, i32) {
    %c0_i32 = arith.constant 0 : i32
    %c0_i32_0 = arith.constant 0 : i32
    %c0_i32_1 = arith.constant 0 : i32
    return %c0_i32, %c0_i32_0 : i32, i32
  }
}

</mosaic_0001>

<bundles_post_ra>
// kernel: cnn_forward.1
= control target key start
LH: loop header
LB: loop body
LE: loop exit
PB: predicated region body
PF: predicated region fallthrough
CT: control target
= control target key end

     0   :  { %17 = vsyncpa [#allocation5], 0  ;;  %s1789_s0 = inlined_call_operand.vmem [shape: f32[9,8,64], index: 0, kind: input, shape index: {}]   ;;  %s1790_s1 = inlined_call_operand.vmem [shape: f32[72], index: 1, kind: input, shape index: {}]   ;;  %s1791_s2 = inlined_call_operand.vmem [shape: f32[8], index: 2, kind: input, shape index: {}]   ;;  %s1792_s3 = inlined_call_operand.vmem [shape: f32[512,16], index: 3, kind: input, shape index: {}]   ;;  %s1793_s4 = inlined_call_operand.vmem [shape: f32[1,16], index: 4, kind: input, shape index: {}]   ;;  %s1794_s5 = inlined_call_operand.vmem [shape: f32[1,16], index: 5, kind: input, shape index: {}]   ;;  %s1795_s6 = inlined_call_operand.vmem [shape: f32[1,16], index: 6, kind: input, shape index: {}]   ;;  %s1796_s7 = inlined_call_operand.<no memory space> [shape: f32[1], index: 7, kind: input, shape index: {}]   ;;  %s1797_s8 = inlined_call_operand.vmem [shape: f32[1,16], index: 8, kind: input, shape index: {}]   ;;  %s1798_s9 = inlined_call_operand.<no memory space> [shape: f32[1], index: 9, kind: input, shape index: {}]   ;;  %s1799_s10 = inlined_call_operand.vmem [shape: f32[2,1], index: 10, kind: output, shape index: {}]  }
   0x1   :  { %s27_s15 = sshll.u32 %s1790_s1, 4  ;;  %s28_s15 = int_to_ptr.vmem [resolvable:$true] %s27_s15 }
   0x2   :  { %18 = vsyncpa [#allocation7], 0  ;;  %s37_s18 = sshll.u32 %s1791_s2, 4  ;;  %s971_s19 = scalar_lea.vmem %s28_s15, 16  ;;  %s38_s18 = int_to_ptr.vmem [resolvable:$true] %s37_s18 }
   0x3   :  { %p972_p0 = scmp.ne.s32.totalorder %s28_s15, %s971_s19  ;;  %p976_p1 = scmp.lt.s32.totalorder %s28_s15, %s28_s15 }
   0x4   :  { %p977_p2 = scmp.lt.s32.totalorder %s971_s19, %s971_s19 }
   0x6   :  { %p978_p3 = por %p977_p2, %p976_p1 }
   0x8   :  { %p979_p4 = pnand %p978_p3, %p972_p0 }
   0xa   :  { %982 = shalt.err (!%p979_p4)
}
   0xb   :  { %s999_s20 = smov [#allocation4]   ;;  %s983_s21 = scalar_lea.vmem %s38_s18, 16 }
   0xc   :  { %30 = dma.vmem_to_smem %s28_s15, 16, %s999_s20, [#allocation5]  }
   0xd   :  { %p984_p5 = scmp.ne.s32.totalorder %s38_s18, %s983_s21  ;;  %p988_p6 = scmp.lt.s32.totalorder %s38_s18, %s38_s18 }
   0xe   :  { %p989_p7 = scmp.lt.s32.totalorder %s983_s21, %s983_s21 }
  0x10   :  { %p990_p8 = por %p989_p7, %p988_p6 }
  0x12   :  { %p991_p9 = pnand %p990_p8, %p984_p5 }
  0x14   :  { %994 = shalt.err (!%p991_p9)
}
  0x15   :  { %s1000_s1 = smov [#allocation6]  }
  0x16   :  { %40 = dma.vmem_to_smem %s38_s18, 16, %s1000_s1, [#allocation7]  }
  0x17   :  { %995 = dma.done.wait [#allocation5], 16  }
  0x18   :  { %996 = vsyncadd [#allocation5], 4294967280 }
  0x19   :  { %997 = dma.done.wait [#allocation7], 16  }
  0x1a   :  { %998 = vsyncadd [#allocation7], 4294967280 }
  0x1b   :  { %61 = sfence }
  0x1c   :  { %s730_s2 = sld [smem:[#allocation4 + $0x3]]  ;;  %s734_s22 = sld [smem:[#allocation4 + $0x7]]  ;;  %v1074_v0 = vld [vmem:[%s1789_s0] sm:$0xff]  ;;  %v1086_v2 = vld [vmem:[%s1789_s0 + $0x8] sm:$0xff]  ;;  %v1098_v6 = vld [vmem:[%s1789_s0 + $0x10] sm:$0xff]  ;;  %vm439_vm0 = vcmask 523264  }
  0x1d   :  { %s739_s23 = sld [smem:[#allocation4 + $0xb]]  ;;  %s743_s24 = sld [smem:[#allocation4 + $0xf]]  ;;  %v460_v1 = vld [vmem:[%s1792_s3 + $0x80] sm:$0xff]  ;;  %v461_v3 = vld [vmem:[%s1792_s3 + $0x88] sm:$0xff]  ;;  %v1109_v12 = vld [vmem:[%s1789_s0 + $0x18] sm:$0xff]  ;;  %vm656_vm1 = vcmask 123904  }
  0x1e   :  { %s1063_s25 = sld [smem:[#allocation4 + $0x13]]  ;;  %s1065_s26 = sld [smem:[#allocation4 + $0x17]]  ;;  %v888_v7 = vpack.c.bf16 %v461_v3, %v460_v1  ;;  %v1130_v21 = vld [vmem:[%s1789_s0 + $0x20] sm:$0xff]  ;;  %v1141_v26 = vld [vmem:[%s1789_s0 + $0x28] sm:$0xff]  ;;  %v1146_v27 = vld [vmem:[%s1789_s0 + $0x30] sm:$0xff]  ;;  %vm720_vm3 = vcmask 1024  }
  0x1f   :  { %s1067_s27 = sld [smem:[#allocation4 + $0x1b]]  ;;  %s1069_s28 = sld [smem:[#allocation4 + $0x1f]]  ;;  %v1171_v40 = vld [vmem:[%s1789_s0 + $0x38] sm:$0xff]  ;;  %v1182_v45 = vld [vmem:[%s1789_s0 + $0x40] sm:$0xff] }
  0x20   :  { %s1076_s11 = sld [smem:[#allocation4 + $0x23]]  ;;  %s1078_s12 = sld [smem:[#allocation4 + $0x27]]  ;;  %889 = vmatprep.subr.bf16.mxu0 %v888_v7 }
  0x21   :  { %s1088_s17 = sld [smem:[#allocation4 + $0x2b]]  ;;  %s1090_s18 = sld [smem:[#allocation4 + $0x2f]] }
  0x22   :  { %v73_v4 = vstv %s730_s2  ;;  %v85_v5 = vstv %s734_s22  ;;  %s1100_s29 = sld [smem:[#allocation4 + $0x33]]  ;;  %s1102_s30 = sld [smem:[#allocation4 + $0x37]] }
  0x23   :  { %v74_v8 = vmul.f32 %v73_v4, %v1074_v0  ;;  %v86_v9 = vmul.f32 %v85_v5, %v1074_v0  ;;  %v102_v10 = vstv %s739_s23  ;;  %v118_v11 = vstv %s743_s24  ;;  %s1111_s13 = sld [smem:[#allocation4 + $0x3b]]  ;;  %s1113_s14 = sld [smem:[#allocation4 + $0x3f]] }
  0x24   :  { %v103_v13 = vmul.f32 %v1086_v2, %v102_v10  ;;  %v119_v14 = vmul.f32 %v1086_v2, %v118_v11  ;;  %v136_v15 = vstv %s1063_s25  ;;  %v152_v16 = vstv %s1065_s26  ;;  %s1119_s15 = sld [smem:[#allocation4 + $0x43]]  ;;  %s1121_s16 = sld [smem:[#allocation4 + $0x47]] }
  0x25   :  { %v137_v17 = vmul.f32 %v1098_v6, %v136_v15  ;;  %v153_v18 = vmul.f32 %v1098_v6, %v152_v16  ;;  %v170_v19 = vstv %s1067_s27  ;;  %v186_v20 = vstv %s1069_s28  ;;  %s1132_s25 = sld [smem:[#allocation6 + $0x3]]  ;;  %s1134_s26 = sld [smem:[#allocation6 + $0x7]] }
  0x26   :  { %v104_v22 = vadd.f32 %v103_v13, %v74_v8  ;;  %v120_v23 = vadd.f32 %v119_v14, %v86_v9  ;;  %v171_v24 = vmul.f32 %v1109_v12, %v170_v19  ;;  %v187_v25 = vmul.f32 %v1109_v12, %v186_v20  ;;  %s1148_s21 = sld [smem:[#allocation4 + $0x1]]  ;;  %s1154_s1 = sld [smem:[#allocation4 + $0x5]] }
  0x27   :  { %v204_v28 = vstv %s1076_s11  ;;  %v220_v29 = vstv %s1078_s12  ;;  %v238_v30 = vstv %s1088_s17  ;;  %v254_v31 = vstv %s1090_s18  ;;  %s1156_s2 = sld [smem:[#allocation4 + $0x9]]  ;;  %s1160_s22 = sld [smem:[#allocation4 + $0xd]] }
  0x28   :  { %v138_v32 = vadd.f32 %v137_v17, %v104_v22  ;;  %v154_v33 = vadd.f32 %v153_v18, %v120_v23  ;;  %v205_v34 = vmul.f32 %v1130_v21, %v204_v28  ;;  %v221_v35 = vmul.f32 %v1130_v21, %v220_v29  ;;  %s1162_s23 = sld [smem:[#allocation4 + $0x11]]  ;;  %s1173_s17 = sld [smem:[#allocation4 + $0x15]] }
  0x29   :  { %v239_v36 = vmul.f32 %v1141_v26, %v238_v30  ;;  %v255_v37 = vmul.f32 %v1141_v26, %v254_v31  ;;  %v272_v38 = vstv %s1100_s29  ;;  %v288_v39 = vstv %s1102_s30  ;;  %s1175_s18 = sld [smem:[#allocation4 + $0x19]]  ;;  %s1184_s29 = sld [smem:[#allocation4 + $0x1d]] }
  0x2a   :  { %v172_v41 = vadd.f32 %v171_v24, %v138_v32  ;;  %v188_v42 = vadd.f32 %v187_v25, %v154_v33  ;;  %v273_v43 = vmul.f32 %v1146_v27, %v272_v38  ;;  %v289_v44 = vmul.f32 %v1146_v27, %v288_v39  ;;  %s1192_s30 = sld [smem:[#allocation4 + $0x21]]  ;;  %s1194_s0 = sld [smem:[#allocation4 + $0x25]] }
  0x2b   :  { %v306_v46 = vstv %s1111_s13  ;;  %v322_v47 = vstv %s1113_s14  ;;  %v340_v48 = vstv %s1119_s15  ;;  %v356_v49 = vstv %s1121_s16  ;;  %s1202_s13 = sld [smem:[#allocation4 + $0x29]]  ;;  %s1204_s14 = sld [smem:[#allocation4 + $0x2d]] }
  0x2c   :  { %v206_v50 = vadd.f32 %v205_v34, %v172_v41  ;;  %v222_v51 = vadd.f32 %v221_v35, %v188_v42  ;;  %v307_v52 = vmul.f32 %v1171_v40, %v306_v46  ;;  %v323_v53 = vmul.f32 %v1171_v40, %v322_v47  ;;  %s1212_s15 = sld [smem:[#allocation4 + $0x31]]  ;;  %s1214_s16 = sld [smem:[#allocation4 + $0x35]] }
  0x2d   :  { %v341_v54 = vmul.f32 %v1182_v45, %v340_v48  ;;  %v357_v55 = vmul.f32 %v1182_v45, %v356_v49  ;;  %v384_v56 = vstv %s1132_s25  ;;  %v416_v57 = vstv %s1134_s26  ;;  %s1220_s25 = sld [smem:[#allocation4 + $0x39]]  ;;  %s1222_s26 = sld [smem:[#allocation4 + $0x3d]] }
  0x2e   :  { %v240_v58 = vadd.f32 %v239_v36, %v206_v50  ;;  %v256_v59 = vadd.f32 %v255_v37, %v222_v51  ;;  %v67_v60 = vstv %s1148_s21  ;;  %v79_v61 = vstv %s1154_s1  ;;  %s1230_s20 = sld [smem:[#allocation4 + $0x41]]  ;;  %s1232_s27 = sld [smem:[#allocation4 + $0x45]] }
  0x2f   :  { %v68_v62 = vmul.f32 %v67_v60, %v1074_v0  ;;  %v80_v63 = vmul.f32 %v79_v61, %v1074_v0  ;;  %v94_v1 = vstv %s1156_s2  ;;  %v110_v3 = vstv %s1160_s22  ;;  %s1238_s28 = sld [smem:[#allocation6 + $0x1]]  ;;  %s1240_s21 = sld [smem:[#allocation6 + $0x5]] }
  0x30   :  { %v274_v4 = vadd.f32 %v273_v43, %v240_v58  ;;  %v290_v5 = vadd.f32 %v289_v44, %v256_v59  ;;  %v95_v7 = vmul.f32 %v1086_v2, %v94_v1  ;;  %v111_v8 = vmul.f32 %v1086_v2, %v110_v3  ;;  %v445_v58 = vld [vmem:[%s1792_s3 + $0x8] sm:$0xff]  ;;  %v462_v3 = vld [vmem:[%s1792_s3 + $0x90] sm:$0xff]  ;;  %s1284_s2 = sld [smem:[#allocation4 + $0x2]]  ;;  %s1576_s22 = sld [smem:[#allocation4 + $0x1e]] }
  0x31   :  { %v128_v9 = vstv %s1162_s23  ;;  %v144_v10 = vstv %s1173_s17  ;;  %v162_v11 = vstv %s1175_s18  ;;  %v178_v13 = vstv %s1184_s29  ;;  %s1362_s18 = sld [smem:[#allocation4 + $0x12]]  ;;  %s1540_s29 = sld [smem:[#allocation4 + $0x6]] }
  0x32   :  { %v308_v14 = vadd.f32 %v307_v52, %v274_v4  ;;  %v324_v15 = vadd.f32 %v323_v53, %v290_v5  ;;  %v96_v16 = vadd.f32 %v95_v7, %v68_v62  ;;  %v112_v17 = vadd.f32 %v111_v8, %v80_v63  ;;  %v476_v63 = vld [vmem:[%s1792_s3 + $0x100] sm:$0xff]  ;;  %v477_v1 = vld [vmem:[%s1792_s3 + $0x108] sm:$0xff]  ;;  %v463_v4 = vld [vmem:[%s1792_s3 + $0x98] sm:$0xff]  ;;  %s1418_s24 = sld [smem:[#allocation4 + $0x1a]]  ;;  %s1578_s23 = sld [smem:[#allocation4 + $0x26]] }
  0x33   :  { %v129_v18 = vmul.f32 %v1098_v6, %v128_v9  ;;  %v145_v19 = vmul.f32 %v1098_v6, %v144_v10  ;;  %v163_v20 = vmul.f32 %v1109_v12, %v162_v11  ;;  %v179_v22 = vmul.f32 %v1109_v12, %v178_v13  ;;  %v494_v10 = vld [vmem:[%s1792_s3 + $0x190] sm:$0xff]  ;;  %v495_v11 = vld [vmem:[%s1792_s3 + $0x198] sm:$0xff]  ;;  %s1476_s17 = sld [smem:[#allocation4 + $0x32]]  ;;  %s803_s1 = sld [smem:[#allocation4 + $0x44]] }
  0x34   :  { %v342_v23 = vadd.f32 %v341_v54, %v308_v14  ;;  %v358_v24 = vadd.f32 %v357_v55, %v324_v15  ;;  %v196_v25 = vstv %s1192_s30  ;;  %v212_v28 = vstv %s1194_s0  ;;  %v492_v55 = vld [vmem:[%s1792_s3 + $0x180] sm:$0xff]  ;;  %s1538_s19 = sld [smem:[#allocation4 + $0x42]]  ;;  %s1599_s0 = sld [smem:[#allocation4 + $0x36]] }
  0x35   :  { %v130_v29 = vadd.f32 %v129_v18, %v96_v16  ;;  %v146_v30 = vadd.f32 %v145_v19, %v112_v17  ;;  %v197_v31 = vmul.f32 %v1130_v21, %v196_v25  ;;  %v213_v32 = vmul.f32 %v1130_v21, %v212_v28  ;;  %v1291_v17 = vld [vmem:[%s1792_s3 + $0x10] sm:$0xff]  ;;  %v1296_v18 = vld [vmem:[%s1792_s3 + $0x18] sm:$0xff]  ;;  %v1313_v28 = vld [vmem:[%s1792_s3 + $0xa0] sm:$0xff]  ;;  %s1679_s30 = sld [smem:[#allocation4 + $0x30]] }
  0x36   :  { %v385_v33 = vadd.f32 %v384_v56, %v342_v23  ;;  %v417_v34 = vadd.f32 %v416_v57, %v358_v24  ;;  %v230_v35 = vstv %s1202_s13  ;;  %v246_v36 = vstv %s1204_s14  ;;  %v493_v56 = vld [vmem:[%s1792_s3 + $0x188] sm:$0xff]  ;;  %v444_v57 = vld [vmem:[%s1792_s3] sm:$0xff]  ;;  %s1325_s14 = sld [smem:[#allocation4 + $0xa]]  ;;  %s1732_s13 = sld [smem:[#allocation4 + $0x2c]] }
  0x37   :  { %v164_v37 = vadd.f32 %v163_v20, %v130_v29  ;;  %v180_v38 = vadd.f32 %v179_v22, %v146_v30  ;;  %v231_v39 = vmul.f32 %v1141_v26, %v230_v35  ;;  %v247_v41 = vmul.f32 %v1141_v26, %v246_v36  ;;  %v1301_v19 = vld [vmem:[%s1792_s3 + $0x110] sm:$0xff]  ;;  %v1306_v20 = vld [vmem:[%s1792_s3 + $0x118] sm:$0xff]  ;;  %v1318_v29 = vld [vmem:[%s1792_s3 + $0xa8] sm:$0xff] }
  0x38   :  { %v386_v42 = vmax.f32 %v385_v33, 0.0  ;;  %v418_v43 = vmax.f32 %v417_v34, 0.0  ;;  %v264_v44 = vstv %s1212_s15  ;;  %v280_v46 = vstv %s1214_s16  ;;  %v1323_v30 = vld [vmem:[%s1792_s3 + $0x1a0] sm:$0xff]  ;;  %v1330_v35 = vld [vmem:[%s1792_s3 + $0x1a8] sm:$0xff]  ;;  %s1001_s16 = smov 64   ;;  %s1558_s15 = sld [smem:[#allocation4 + $0x16]] }
  0x39   :  { %v198_v47 = vadd.f32 %v197_v31, %v164_v37  ;;  %v214_v48 = vadd.f32 %v213_v32, %v180_v38  ;;  %v265_v49 = vmul.f32 %v1146_v27, %v264_v44  ;;  %v281_v50 = vmul.f32 %v1146_v27, %v280_v46  ;;  %v1335_v36 = vld [vmem:[%s1792_s3 + $0x20] sm:$0xff]  ;;  %v1340_v37 = vld [vmem:[%s1792_s3 + $0x28] sm:$0xff]  ;;  %v1355_v46 = vld [vmem:[%s1792_s3 + $0xb0] sm:$0xff] }
  0x3a   :  { %v387_v51 = vrot.slane %v386_v42, 4  ;;  %v419_v52 = vrot.slane %v418_v43, 4  ;;  %v298_v53 = vstv %s1220_s25  ;;  %v314_v54 = vstv %s1222_s26  ;;  %v1350_v44 = vld [vmem:[%s1792_s3 + $0x128] sm:$0xff]  ;;  %s1627_s26 = sld [smem:[#allocation4 + $0x10]]  ;;  %s1738_s25 = sld [smem:[#allocation4 + $0x34]] }
  0x3b   :  { %v232_v59 = vadd.f32 %v231_v39, %v198_v47  ;;  %v248_v60 = vadd.f32 %v247_v41, %v214_v48  ;;  %v299_v61 = vmul.f32 %v1171_v40, %v298_v53  ;;  %v315_v62 = vmul.f32 %v1171_v40, %v314_v54  ;;  %v1360_v47 = vld [vmem:[%s1792_s3 + $0xb8] sm:$0xff]  ;;  %v1377_v53 = vld [vmem:[%s1792_s3 + $0x30] sm:$0xff] }
  0x3c   :  { %v388_v5 = vmax.f32 %v386_v42, %v387_v51  ;;  %v420_v7 = vmax.f32 %v418_v43, %v419_v52  ;;  %v332_v8 = vstv %s1230_s20  ;;  %v348_v9 = vstv %s1232_s27  ;;  %v1345_v43 = vld [vmem:[%s1792_s3 + $0x120] sm:$0xff]  ;;  %v1367_v51 = vld [vmem:[%s1792_s3 + $0x1b0] sm:$0xff]  ;;  %s1458_s20 = sld [smem:[#allocation4 + $0x22]] }
  0x3d   :  { %v266_v13 = vadd.f32 %v265_v49, %v232_v59  ;;  %v282_v14 = vadd.f32 %v281_v50, %v248_v60  ;;  %v333_v15 = vmul.f32 %v1182_v45, %v332_v8  ;;  %v349_v16 = vmul.f32 %v1182_v45, %v348_v9  ;;  %v1372_v52 = vld [vmem:[%s1792_s3 + $0x1b8] sm:$0xff]  ;;  %v1401_v60 = vld [vmem:[%s1792_s3 + $0xc0] sm:$0xff]  ;;  %v1432_v8 = vld [vmem:[%s1792_s3 + $0x48] sm:$0xff]  ;;  %s1460_s27 = sld [smem:[#allocation4 + $0x2a]] }
  0x3e   :  { %v389_v22 = vrot.slane %v388_v5, 6  ;;  %v421_v23 = vrot.slane %v420_v7, 6  ;;  %v368_v24 = vstv %s1238_s28  ;;  %v400_v25 = vstv %s1240_s21  ;;  %v1382_v54 = vld [vmem:[%s1792_s3 + $0x38] sm:$0xff]  ;;  %v1437_v9 = vld [vmem:[%s1792_s3 + $0x140] sm:$0xff]  ;;  %s1500_s21 = sld [smem:[#allocation4 + $0x3a]]  ;;  %s1556_s28 = sld [smem:[#allocation4 + $0xe]] }
  0x3f   :  { %v300_v31 = vadd.f32 %v299_v61, %v266_v13  ;;  %v316_v32 = vadd.f32 %v315_v62, %v282_v14  ;;  %v920_v33 = vpack.c.bf16 %v493_v56, %v492_v55  ;;  %v890_v34 = vpack.c.bf16 %v445_v58, %v444_v57  ;;  %v1387_v55 = vld [vmem:[%s1792_s3 + $0x130] sm:$0xff]  ;;  %v1392_v56 = vld [vmem:[%s1792_s3 + $0x138] sm:$0xff]  ;;  %v1406_v61 = vld [vmem:[%s1792_s3 + $0xc8] sm:$0xff] }
  0x40   :  { %v390_v38 = vmax.f32 %v388_v5, %v389_v22  ;;  %v422_v39 = vmax.f32 %v420_v7, %v421_v23  ;;  %v922_v41 = vpack.c.bf16 %v477_v1, %v476_v63  ;;  %v892_v42 = vpack.c.bf16 %v463_v4, %v462_v3  ;;  %v1411_v62 = vld [vmem:[%s1792_s3 + $0x1c0] sm:$0xff]  ;;  %v1416_v63 = vld [vmem:[%s1792_s3 + $0x1c8] sm:$0xff]  ;;  %v1450_v13 = vld [vmem:[%s1792_s3 + $0xd0] sm:$0xff] }
  0x41   :  { %v334_v48 = vadd.f32 %v333_v15, %v300_v31  ;;  %v350_v49 = vadd.f32 %v349_v16, %v316_v32  ;;  %921 = vmatprep.subr.bf16.mxu1 %v920_v33  ;;  %891 = vmatpush3.bf16.msra.mxu0 %v890_v34  ;;  %v924_v50 = vpack.c.bf16 %v495_v11, %v494_v10  ;;  %v1427_v7 = vld [vmem:[%s1792_s3 + $0x40] sm:$0xff]  ;;  %v1442_v10 = vld [vmem:[%s1792_s3 + $0x148] sm:$0xff]  ;;  %v1455_v14 = vld [vmem:[%s1792_s3 + $0xd8] sm:$0xff]  ;;  %v70_v15 = vstv %s1284_s2 }
  0x42   :  { %v955_v57 = vpack.i.bf16 %v422_v39, %v390_v38  ;;  %923 = vmatpush3.bf16.msra.mxu1 %v922_v41  ;;  %893 = vmatprep.subr.bf16.mxu0 %v892_v42  ;;  %v894_v58 = vpack.c.bf16 %v1296_v18, %v1291_v17  ;;  %v926_v59 = vpack.c.bf16 %v1306_v20, %v1301_v19  ;;  %v1469_v20 = vld [vmem:[%s1792_s3 + $0x1d0] sm:$0xff]  ;;  %v1474_v22 = vld [vmem:[%s1792_s3 + $0x1d8] sm:$0xff]  ;;  %v98_v31 = vstv %s1325_s14  ;;  %v1519_v38 = vld [vmem:[%s1792_s3 + $0xe8] sm:$0xff] }
  0x43   :  { %v369_v1 = vadd.f32 %v368_v24, %v334_v48  ;;  %v401_v3 = vadd.f32 %v400_v25, %v350_v49  ;;  %925 = vmatprep.subr.bf16.mxu1 %v924_v50  ;;  %v896_v4 = vpack.c.bf16 %v1318_v29, %v1313_v28  ;;  %v928_v5 = vpack.c.bf16 %v1330_v35, %v1323_v30  ;;  %v1487_v28 = vld [vmem:[%s1792_s3 + $0x50] sm:$0xff]  ;;  %v1492_v29 = vld [vmem:[%s1792_s3 + $0x58] sm:$0xff] }
  0x44   :  { %956 = vrot.lane.b32.xlu0 %v955_v57, %s1001_s16  ;;  %v898_v11 = vpack.c.bf16 %v1340_v37, %v1335_v36  ;;  %v930_v18 = vpack.c.bf16 %v1350_v44, %v1345_v43  ;;  %v900_v19 = vpack.c.bf16 %v1360_v47, %v1355_v46  ;;  %v932_v23 = vpack.c.bf16 %v1372_v52, %v1367_v51  ;;  %v1497_v30 = vld [vmem:[%s1792_s3 + $0x150] sm:$0xff]  ;;  %v1509_v36 = vld [vmem:[%s1792_s3 + $0x158] sm:$0xff]  ;;  %v1514_v37 = vld [vmem:[%s1792_s3 + $0xe0] sm:$0xff] }
  0x45   :  { %v370_v16 = vmax.f32 %v369_v1, 0.0  ;;  %v402_v17 = vmax.f32 %v401_v3, 0.0  ;;  %895 = vmatpush3.bf16.msra.mxu0 %v894_v58  ;;  %v902_v24 = vpack.c.bf16 %v1382_v54, %v1377_v53  ;;  %v934_v25 = vpack.c.bf16 %v1392_v56, %v1387_v55  ;;  %v1530_v43 = vld [vmem:[%s1792_s3 + $0x1e0] sm:$0xff]  ;;  %v1535_v44 = vld [vmem:[%s1792_s3 + $0x1e8] sm:$0xff] }
  0x46   :  { %927 = vmatpush3.bf16.msra.mxu1 %v926_v59  ;;  %897 = vmatprep.subr.bf16.mxu0 %v896_v4  ;;  %v904_v34 = vpack.c.bf16 %v1406_v61, %v1401_v60  ;;  %v936_v35 = vpack.c.bf16 %v1416_v63, %v1411_v62  ;;  %v906_v39 = vpack.c.bf16 %v1432_v8, %v1427_v7  ;;  %v132_v46 = vstv %s1362_s18  ;;  %v1549_v51 = vld [vmem:[%s1792_s3 + $0x60] sm:$0xff]  ;;  %v1554_v52 = vld [vmem:[%s1792_s3 + $0x68] sm:$0xff]  ;;  %v1583_v61 = vld [vmem:[%s1792_s3 + $0xf0] sm:$0xff]  ;;  %s1602_s18 = sld [smem:[#allocation4 + $0x3e]] }
  0x47   :  { %v371_v32 = vrot.slane %v370_v16, 4  ;;  %v403_v33 = vrot.slane %v402_v17, 4  ;;  %929 = vmatprep.subr.bf16.mxu1 %v928_v5  ;;  %v938_v41 = vpack.c.bf16 %v1442_v10, %v1437_v9  ;;  %v908_v42 = vpack.c.bf16 %v1455_v14, %v1450_v13  ;;  %v1567_v55 = vld [vmem:[%s1792_s3 + $0x160] sm:$0xff]  ;;  %v1572_v56 = vld [vmem:[%s1792_s3 + $0x168] sm:$0xff]  ;;  %v1588_v62 = vld [vmem:[%s1792_s3 + $0xf8] sm:$0xff] }
  0x48   :  { %v940_v49 = vpack.c.bf16 %v1474_v22, %v1469_v20  ;;  %v910_v50 = vpack.c.bf16 %v1492_v29, %v1487_v28  ;;  %v942_v53 = vpack.c.bf16 %v1509_v36, %v1497_v30  ;;  %v912_v54 = vpack.c.bf16 %v1519_v38, %v1514_v37  ;;  %v458_v14 = vld [vmem:[%s1792_s3 + $0x70] sm:$0xff] }
  0x49   :  { %v372_v47 = vmax.f32 %v370_v16, %v371_v32  ;;  %v404_v48 = vmax.f32 %v402_v17, %v403_v33  ;;  %899 = vmatpush3.bf16.msra.mxu0 %v898_v11  ;;  %v71_v57 = vmul.f32 %v70_v15, %v1074_v0  ;;  %v166_v58 = vstv %s1418_s24  ;;  %s1592_s24 = sld [smem:[#allocation4 + $0x2e]] }
  0x4a   :  { %931 = vmatpush3.bf16.msra.mxu1 %v930_v18  ;;  %901 = vmatprep.subr.bf16.mxu0 %v900_v19  ;;  %v99_v63 = vmul.f32 %v1086_v2, %v98_v31  ;;  %v133_v1 = vmul.f32 %v1098_v6, %v132_v46  ;;  %v944_v3 = vpack.c.bf16 %v1535_v44, %v1530_v43  ;;  %v200_v5 = vstv %s1458_s20  ;;  %s1610_s20 = sld [smem:[#allocation4 + $0x46]] }
  0x4b   :  { %v373_v59 = vrot.slane %v372_v47, 6  ;;  %v405_v60 = vrot.slane %v404_v48, 6  ;;  %933 = vmatprep.subr.bf16.mxu1 %v932_v23  ;;  %v167_v4 = vmul.f32 %v1109_v12, %v166_v58  ;;  %v234_v11 = vstv %s1460_s27  ;;  %s1614_s27 = sld [smem:[#allocation4]]  ;;  %v1636_v58 = vld [vmem:[%s1792_s3 + $0x1f8] sm:$0xff] }
  0x4c   :  { %v100_v17 = vadd.f32 %v99_v63, %v71_v57  ;;  %v268_v18 = vstv %s1476_s17  ;;  %v914_v19 = vpack.c.bf16 %v1554_v52, %v1549_v51  ;;  %v946_v23 = vpack.c.bf16 %v1572_v56, %v1567_v55  ;;  %s1616_s17 = sld [smem:[#allocation4 + $0x8]] }
  0x4d   :  { %v374_v15 = vmax.f32 %v372_v47, %v373_v59  ;;  %v406_v16 = vmax.f32 %v404_v48, %v405_v60  ;;  %903 = vmatpush3.bf16.msra.mxu0 %v902_v24  ;;  %v916_v31 = vpack.c.bf16 %v1588_v62, %v1583_v61  ;;  %v201_v33 = vmul.f32 %v1130_v21, %v200_v5  ;;  %v1624_v48 = vld [vmem:[%s1792_s3 + $0x1f0] sm:$0xff] }
  0x4e   :  { %935 = vmatpush3.bf16.msra.mxu1 %v934_v25  ;;  %905 = vmatprep.subr.bf16.mxu0 %v904_v34  ;;  %v134_v32 = vadd.f32 %v133_v1, %v100_v17  ;;  %v235_v25 = vmul.f32 %v1141_v26, %v234_v11  ;;  %v269_v34 = vmul.f32 %v1146_v27, %v268_v18  ;;  %v302_v46 = vstv %s1500_s21  ;;  %v490_v5 = vld [vmem:[%s1792_s3 + $0x170] sm:$0xff]  ;;  %v491_v11 = vld [vmem:[%s1792_s3 + $0x178] sm:$0xff]  ;;  %s808_s21 = sld [smem:[#allocation6 + $0x2]] }
  0x4f   :  { %v960_v24 = vpack.i.bf16 %v406_v16, %v374_v15  ;;  %937 = vmatprep.subr.bf16.mxu1 %v936_v35  ;;  %v336_v47 = vstv %s1538_s19  ;;  %v82_v35 = vstv %s1540_s29  ;;  %v114_v60 = vstv %s1556_s28  ;;  %s1641_s19 = sld [smem:[#allocation4 + $0x18]] }
  0x50   :  { %v168_v57 = vadd.f32 %v167_v4, %v134_v32  ;;  %v83_v59 = vmul.f32 %v82_v35, %v1074_v0  ;;  %v148_v63 = vstv %s1558_s15  ;;  %s1643_s29 = sld [smem:[#allocation4 + $0x20]]  ;;  %v115_v7 = vmul.f32 %v1086_v2, %v114_v60 }
  0x51   :  { %961 = vrot.lane.b32.xlu0 %v960_v24, %s1001_s16  ;;  %907 = vmatpush3.bf16.msra.mxu0 %v906_v39  ;;  %v149_v8 = vmul.f32 %v1098_v6, %v148_v63  ;;  %v182_v39 = vstv %s1576_s22  ;;  %v216_v1 = vstv %s1578_s23  ;;  %s1655_s16 = sld [smem:[#allocation4 + $0x28]]  ;;  %v303_v9 = vmul.f32 %v1171_v40, %v302_v46 }
  0x52   :  { %939 = vmatpush3.bf16.msra.mxu1 %v938_v41  ;;  %909 = vmatprep.subr.bf16.mxu0 %v908_v42  ;;  %v202_v4 = vadd.f32 %v201_v33, %v168_v57  ;;  %v337_v10 = vmul.f32 %v1182_v45, %v336_v47  ;;  %v250_v13 = vstv %s1592_s24  ;;  %v459_v41 = vld [vmem:[%s1792_s3 + $0x78] sm:$0xff]  ;;  %v948_v42 = vpack.c.bf16 %v1636_v58, %v1624_v48  ;;  %s1695_s3 = sld [smem:[#allocation4 + $0x38]]  ;;  %s1697_s24 = sld [smem:[#allocation4 + $0x4]] }
  0x53   :  { %941 = vmatprep.subr.bf16.mxu1 %v940_v49  ;;  %v116_v20 = vadd.f32 %v115_v7, %v83_v59  ;;  %v183_v22 = vmul.f32 %v1109_v12, %v182_v39  ;;  %v284_v49 = vstv %s1599_s0  ;;  %v217_v16 = vmul.f32 %v1130_v21, %v216_v1  ;;  %s1704_s0 = sld [smem:[#allocation4 + $0xc]] }
  0x54   :  { %v236_v15 = vadd.f32 %v235_v25, %v202_v4  ;;  %v251_v17 = vmul.f32 %v1141_v26, %v250_v13  ;;  %v318_v18 = vstv %s1602_s18  ;;  %v285_v28 = vmul.f32 %v1146_v27, %v284_v49  ;;  %s1706_s18 = sld [smem:[#allocation4 + $0x14]] }
  0x55   :  { %911 = vmatpush3.bf16.msra.mxu0 %v910_v50  ;;  %v150_v24 = vadd.f32 %v149_v8, %v116_v20  ;;  %v352_v29 = vstv %s1610_s20  ;;  %v918_v50 = vpack.c.bf16 %v459_v41, %v458_v14  ;;  %v950_v36 = vpack.c.bf16 %v491_v11, %v490_v5  ;;  %s1711_s20 = sld [smem:[#allocation4 + $0x40]] }
  0x56   :  { %943 = vmatpush3.bf16.msra.mxu1 %v942_v53  ;;  %913 = vmatprep.subr.bf16.mxu0 %v912_v54  ;;  %v270_v30 = vadd.f32 %v269_v34, %v236_v15  ;;  %v64_v37 = vstv %s1614_s27  ;;  %v90_v38 = vstv %s1616_s17  ;;  %v124_v33 = vstv %s1627_s26  ;;  %s1719_s27 = sld [smem:[#allocation4 + $0x1c]] }
  0x57   :  { %945 = vmatprep.subr.bf16.mxu1 %v944_v3  ;;  %v184_v53 = vadd.f32 %v183_v22, %v150_v24  ;;  %v65_v54 = vmul.f32 %v64_v37, %v1074_v0  ;;  %v91_v32 = vmul.f32 %v1086_v2, %v90_v38  ;;  %v125_v44 = vmul.f32 %v1098_v6, %v124_v33  ;;  %s1721_s17 = sld [smem:[#allocation4 + $0x24]] }
  0x58   :  { %v304_v43 = vadd.f32 %v303_v9, %v270_v30  ;;  %v158_v3 = vstv %s1641_s19  ;;  %v192_v25 = vstv %s1643_s29  ;;  %v226_v34 = vstv %s1655_s16  ;;  %s794_s26 = sld [smem:[#allocation4 + $0x3c]]  ;;  %s812_s19 = sld [smem:[#allocation6 + $0x6]] }
  0x59   :  { %915 = vmatpush3.bf16.msra.mxu0 %v914_v19  ;;  %v218_v51 = vadd.f32 %v217_v16, %v184_v53  ;;  %v92_v52 = vadd.f32 %v91_v32, %v65_v54  ;;  %v159_v19 = vmul.f32 %v1109_v12, %v158_v3  ;;  %v319_v47 = vmul.f32 %v1171_v40, %v318_v18  ;;  %s359_s29 = sld [smem:[#allocation6]]  ;;  %s810_s16 = sld [smem:[#allocation6 + $0x4]] }
  0x5a   :  { %947 = vmatpush3.bf16.msra.mxu1 %v946_v23  ;;  %917 = vmatprep.subr.bf16.mxu0 %v916_v31  ;;  %v338_v46 = vadd.f32 %v337_v10, %v304_v43  ;;  %v193_v61 = vmul.f32 %v1130_v21, %v192_v25  ;;  %v260_v62 = vstv %s1679_s30  ;;  %v353_v23 = vmul.f32 %v1182_v45, %v352_v29 }
  0x5b   :  { %949 = vmatprep.subr.bf16.mxu1 %v948_v42  ;;  %v252_v55 = vadd.f32 %v251_v17, %v218_v51  ;;  %v126_v56 = vadd.f32 %v125_v44, %v92_v52  ;;  %v227_v31 = vmul.f32 %v1141_v26, %v226_v34  ;;  %v294_v57 = vstv %s1695_s3 }
  0x5c   :  { %v76_v58 = vstv %s1697_s24  ;;  %v261_v59 = vmul.f32 %v1146_v27, %v260_v62  ;;  %v106_v63 = vstv %s1704_s0  ;;  %v140_v7 = vstv %s1706_s18 }
  0x5d   :  { %919 = vmatpush3.bf16.msra.mxu0 %v918_v50  ;;  %v286_v48 = vadd.f32 %v285_v28, %v252_v55  ;;  %v160_v35 = vadd.f32 %v159_v19, %v126_v56  ;;  %v77_v60 = vmul.f32 %v76_v58, %v1074_v0  ;;  %v107_v1 = vmul.f32 %v1086_v2, %v106_v63 }
  0x5e   :  { %951 = vmatpush3.bf16.msra.mxu1 %v950_v36  ;;  %v141_v4 = vmul.f32 %v1098_v6, %v140_v7  ;;  %v295_v9 = vmul.f32 %v1171_v40, %v294_v57  ;;  %v328_v10 = vstv %s1711_s20  ;;  %v174_v13 = vstv %s1719_s27 }
  0x5f   :  { %v320_v8 = vadd.f32 %v319_v47, %v286_v48  ;;  %v194_v39 = vadd.f32 %v193_v61, %v160_v35  ;;  %v208_v14 = vstv %s1721_s17  ;;  %v108_v0 = vadd.f32 %v107_v1, %v77_v60 }
  0x60   :  { %v175_v20 = vmul.f32 %v1109_v12, %v174_v13  ;;  %v242_v22 = vstv %s1732_s13  ;;  %v329_v5 = vmul.f32 %v1182_v45, %v328_v10  ;;  %v209_v2 = vmul.f32 %v1130_v21, %v208_v14 }
  0x61   :  { %v354_v41 = vadd.f32 %v353_v23, %v320_v8  ;;  %v228_v42 = vadd.f32 %v227_v31, %v194_v39  ;;  %v142_v11 = vadd.f32 %v141_v4, %v108_v0  ;;  %v276_v15 = vstv %s1738_s25 }
  0x62   :  { %v243_v17 = vmul.f32 %v1141_v26, %v242_v22  ;;  %v310_v18 = vstv %s794_s26  ;;  %v277_v29 = vmul.f32 %v1146_v27, %v276_v15  ;;  %v344_v50 = vstv %s803_s1  ;;  %v814_v22 = vld [vmem:[%s1793_s4] ss:$0 sm:$0xff] }
  0x63   :  { %v262_v49 = vadd.f32 %v261_v59, %v228_v42  ;;  %v176_v16 = vadd.f32 %v175_v20, %v142_v11  ;;  %v311_v12 = vmul.f32 %v1171_v40, %v310_v18  ;;  %v345_v37 = vmul.f32 %v1182_v45, %v344_v50 }
  0x64   :  { %v376_v21 = vstv %s808_s21  ;;  %v408_v54 = vstv %s812_s19  ;;  %v360_v3 = vstv %s359_s29  ;;  %v392_v25 = vstv %s810_s16 }
  0x65   :  { %v296_v6 = vadd.f32 %v295_v9, %v262_v49  ;;  %v210_v28 = vadd.f32 %v209_v2, %v176_v16  ;;  %v377_v32 = vadd.f32 %v376_v21, %v338_v46  ;;  %v409_v26 = vadd.f32 %v408_v54, %v354_v41 }
  0x67   :  { %v330_v24 = vadd.f32 %v329_v5, %v296_v6  ;;  %v244_v30 = vadd.f32 %v243_v17, %v210_v28  ;;  %v378_v33 = vmax.f32 %v377_v32, 0.0  ;;  %v410_v43 = vmax.f32 %v409_v26, 0.0  ;;  %v815_v26 = vld [vmem:[%s1794_s5] ss:$0 sm:$0xff] }
  0x69   :  { %v278_v36 = vadd.f32 %v277_v29, %v244_v30  ;;  %v379_v27 = vrot.slane %v378_v33, 4  ;;  %v411_v44 = vrot.slane %v410_v43, 4  ;;  %v361_v52 = vadd.f32 %v360_v3, %v330_v24 }
  0x6b   :  { %v312_v38 = vadd.f32 %v311_v12, %v278_v36  ;;  %v380_v40 = vmax.f32 %v378_v33, %v379_v27  ;;  %v412_v51 = vmax.f32 %v410_v43, %v411_v44  ;;  %v362_v47 = vmax.f32 %v361_v52, 0.0  ;;  %v816_v43 = vld [vmem:[%s1795_s6] ss:$0 sm:$0xff] }
  0x6c   :  { %v697_v44 = vstv %s1796_s7 }
  0x6d   :  { %v346_v53 = vadd.f32 %v345_v37, %v312_v38  ;;  %v381_v19 = vrot.slane %v380_v40, 6  ;;  %v413_v34 = vrot.slane %v412_v51, 6  ;;  %v363_v62 = vrot.slane %v362_v47, 4 }
  0x6f   :  { %v393_v45 = vadd.f32 %v392_v25, %v346_v53  ;;  %v382_v56 = vmax.f32 %v380_v40, %v381_v19  ;;  %v414_v61 = vmax.f32 %v412_v51, %v413_v34  ;;  %v364_v58 = vmax.f32 %v362_v47, %v363_v62  ;;  %v817_v40 = vld [vmem:[%s1797_s8] ss:$0 sm:$0xff] }
  0x70   :  { %v712_v19 = vstv %s1798_s9 }
  0x71   :  { %v394_v55 = vmax.f32 %v393_v45, 0.0  ;;  %v365_v60 = vrot.slane %v364_v58, 6 }
  0x73   :  { %v395_v23 = vrot.slane %v394_v55, 4  ;;  %v366_v7 = vmax.f32 %v364_v58, %v365_v60 }
  0x75   :  { %v396_v59 = vmax.f32 %v394_v55, %v395_v23 }
  0x77   :  { %v397_v63 = vrot.slane %v396_v59, 6 }
  0x79   :  { %v398_v8 = vmax.f32 %v396_v59, %v397_v63 }
  0xb6   :  { %v957_v46 = vpop.permute.xlu0 %956 }
  0xb7   :  { %v959_v31 = vunpack.i.h.bf16 %v957_v46  ;;  %v958_v48 = vunpack.i.l.bf16 %v957_v46 }
  0xb9   :  { %v441_v35 = vsel %vm439_vm0, %v382_v56, %v958_v48  ;;  %v443_v57 = vsel %vm439_vm0, %v414_v61, %v959_v31 }
  0xba   :  { %572 = vmatprep.mubr.f32.mxu0 %v441_v35  ;;  %642 = vmatprep.mubr.f32.mxu1 %v443_v57 }
  0xc3   :  { %v962_v39 = vpop.permute.xlu0 %961 }
  0xc4   :  { %v964_v1 = vunpack.i.h.bf16 %v962_v39  ;;  %v963_v4 = vunpack.i.l.bf16 %v962_v39 }
  0xc6   :  { %v440_v9 = vsel %vm439_vm0, %v366_v7, %v963_v4  ;;  %v442_v10 = vsel %vm439_vm0, %v398_v8, %v964_v1 }
  0xc7   :  { %573 = vmatmul.mubr.f32.vlgmr.msra.gmra.mrb[0].mxu0 %v440_v9  ;;  %643 = vmatmul.mubr.f32.vlgmr.msra.gmra.mrb[0].mxu1 %v442_v10 }
 0x19a   :  { %v850_v13 = vpop.f32.mrb[0].mxu0  ;;  %v885_v14 = vpop.f32.mrb[0].mxu1 }
 0x19b   :  { %v851_v41 = vpop.f32.mrb[1].mxu0  ;;  %v886_v42 = vpop.f32.mrb[1].mxu1 }
 0x19c   :  { %v852_v0 = vadd.f32 %v851_v41, %v850_v13  ;;  %v887_v20 = vadd.f32 %v886_v42, %v885_v14 }
 0x19e   :  { %v645_v49 = vadd.f32 %v887_v20, %v852_v0 }
 0x1a0   :  { %v655_v5 = vadd.f32 %v814_v22, %v645_v49 }
 0x1a2   :  { %v657_v11 = vsel %vm656_vm1, %v655_v5, 0.0 }
 0x1a3   :  { %v658_v2 = vrot.slane %v657_v11, 4 }
 0x1a5   :  { %v659_v15 = vadd.f32 %v658_v2, %v657_v11 }
 0x1a7   :  { %v660_v6 = vrot.slane %v659_v15, 2 }
 0x1a9   :  { %v661_v16 = vadd.f32 %v660_v6, %v659_v15 }
 0x1ab   :  { %v662_v17 = vrot.slane %v661_v16, 1 }
 0x1ad   :  { %v663_v18 = vadd.f32 %v662_v17, %v661_v16 }
 0x1af   :  { %v665_v24 = vmul.f32 0.5, %v663_v18 }
 0x1b1   :  { %v666_v28 = vsub.f32 %v655_v5, %v665_v24 }
 0x1b3   :  { %v667_v29 = vmul.f32 %v666_v28, %v666_v28 }
 0x1b5   :  { %v668_v50 = vsel %vm656_vm1, %v667_v29, 0.0 }
 0x1b6   :  { %v669_v30 = vrot.slane %v668_v50, 4 }
 0x1b8   :  { %v670_v12 = vadd.f32 %v669_v30, %v668_v50 }
 0x1ba   :  { %v671_v36 = vrot.slane %v670_v12, 2 }
 0x1bc   :  { %v672_v37 = vadd.f32 %v671_v36, %v670_v12 }
 0x1be   :  { %v673_v38 = vrot.slane %v672_v37, 1 }
 0x1c0   :  { %v674_v53 = vadd.f32 %v673_v38, %v672_v37 }
 0x1c2   :  { %v675_v21 = vmul.f32 0.5, %v674_v53 }
 0x1c4   :  { %v676_v54 = vadd.f32 1e-05, %v675_v21 }
 0x1c6   :  { %965 = vrsqrt.f32 %v676_v54 }
 0x1d0   :  { %v966_v32 = vpop.eup %965 }
 0x1d1   :  { %v678_v33 = vmul.f32 %v966_v32, %v666_v28 }
 0x1d3   :  { %v686_v27 = vmul.f32 %v815_v26, %v678_v33 }
 0x1d5   :  { %v694_v3 = vadd.f32 %v816_v43, %v686_v27 }
 0x1d7   :  { %vm696_vm2 = vcmp.ge.f32.partialorder %v694_v3, 0.0  ;;  %v698_v25 = vmul.f32 %v697_v44, %v694_v3 }
 0x1d9   :  { %v699_v51 = vsel %vm696_vm2, %v694_v3, %v698_v25 }
 0x1da   :  { %v707_v52 = vmul.f32 %v817_v40, %v699_v51 }
 0x1dc   :  { %v708_v45 = vsel %vm656_vm1, %v707_v52, 0.0 }
 0x1dd   :  { %709 = vadd.xlane.f32.xlu1 %v708_v45 }
 0x26a   :  { %v710_v34 = vpop.xlane.xlu1 %709 }
 0x26b   :  { %v713_v47 = vadd.f32 %v712_v19, %v710_v34 }
 0x26d   :  { %v714_v55 = vsub.f32 0.0, %v713_v47 }
 0x26f   :  { %v715_v56 = vmul.f32 1.442695, %v714_v55 }
 0x271   :  { %967 = vpow2.f32 %v715_v56 }
 0x27b   :  { %v968_v61 = vpop.eup %967 }
 0x27c   :  { %v717_v46 = vadd.f32 1.0, %v968_v61 }
 0x27e   :  { %969 = vrcp.f32 %v717_v46 }
 0x288   :  { %v970_v62 = vpop.eup %969 }
 0x289   :  { %721 = vst.msk [vmem:[%s1799_s10] sm:$0x3] %vm720_vm3, %v970_v62 }
 0x28a   :  { %726 = vsyncpa [#allocation5], 1 }
 0x28b   :  { %727 = vsyncpa [#allocation7], 1 }

</bundles_post_ra>
